<compile_context>
chip_gen: v6e
topology: v6e:2x2x1
jax: 0.10.0
libtpu: 0.0.40
codegen_flags: <defaults>
</compile_context>

<pallas_src>
import functools

import jax
import jax.numpy as jnp
from jax.experimental import pallas as pl
from jax.experimental.pallas import tpu as pltpu


def _round_up(n, m):
    return ((n + m - 1) // m) * m


def _matT(a, w):
    # a @ w.T with w in (out, in) layout — contract last dims, no in-kernel transpose.
    return jax.lax.dot_general(a, w, (((1,), (1,)), ((), ())),
                               preferred_element_type=jnp.float32)


def _mat(a, w):
    # a @ w (contract a's last dim with w's first dim).
    return jax.lax.dot_general(a, w, (((1,), (0,)), ((), ())),
                               preferred_element_type=jnp.float32)


def hamiltonian_inn_kernel(x_ref, sq_ref, w1_ref, b_ref, out_ref, xc_ref,
                           *, reverse, S):
    # sq_ref : (4, S, S)  bf16  = [wf1, wf2, w2, w2s]
    # w1_ref : (2, S, 2S) bf16  = [w1_fwd, w1_bwd]   (negation folded into w1_bwd)
    # b_ref  : (4, 1, S)  f32   = [bf1, bf2, b1, b2]
    x = x_ref[...]                              # (bm, 2S) bf16
    x1 = x[:, :S]                               # bf16 (matmul operand)
    x2 = x[:, S:].astype(jnp.float32)

    # --- InvertibleCoupling: x2 ± f(x1), f = Linear -> Tanh -> Linear ---
    h = jnp.tanh(_matT(x1, sq_ref[0]) + b_ref[0])
    fx1 = _matT(h.astype(jnp.bfloat16), sq_ref[1]) + b_ref[1]
    x2c = x2 - fx1 if reverse else x2 + fx1

    # --- fused K=2S first layer: [x1 | x2c] slab, one MXU contraction ---
    xc_ref[:, :S] = x1
    xc_ref[:, S:] = x2c.astype(jnp.bfloat16)
    h1 = jnp.tanh(_matT(xc_ref[...], w1_ref[0]) + b_ref[2])      # (bm, S)
    h2 = jnp.tanh(_matT(h1.astype(jnp.bfloat16), sq_ref[2]) + b_ref[3])

    # --- analytic grad of H.sum() wrt post-coupling state ---
    # (w3 folded into w2s; output [dp_dt, -dq_dt] comes out of w1_bwd directly)
    g2 = 1.0 - h2 * h2
    g1 = _mat(g2.astype(jnp.bfloat16), sq_ref[3]) * (1.0 - h1 * h1)
    out_ref[...] = _mat(g1.astype(jnp.bfloat16), w1_ref[1]).astype(out_ref.dtype)


def hamiltonian_inn_forward(state, params, reverse=False, block_batch=None):
    B, D = state.shape
    assert D % 2 == 0, "HamiltonianINN requires an even input_dim"
    half = D // 2
    H = params["w1"].shape[0]
    # Common lane-aligned width for both the input halves and the hidden dim.
    S = max(_round_up(half, 128), _round_up(H, 128), 128)
    f32, bf16 = jnp.float32, jnp.bfloat16

    def pad2(a, r, c):
        a = a.astype(f32)
        return jnp.pad(a, ((0, r - a.shape[0]), (0, c - a.shape[1])))

    def pad1(v, n):
        v = v.reshape(-1).astype(f32)
        return jnp.pad(v, (0, n - v.shape[0]))

    # ---- pack weights (zero padding is mathematically identical) ----
    wf1 = pad2(params["wf1"], S, S)
    wf2 = pad2(params["wf2"], S, S)
    w2 = pad2(params["w2"], S, S)
    w3 = pad1(params["w3"], S)
    w2s = w3[:, None] * w2                                    # fold w3 into w2
    sq = jnp.stack([wf1, wf2, w2, w2s]).astype(bf16)          # (4, S, S)

    w1 = params["w1"].astype(f32)
    w1a = pad2(w1[:, :half], S, S)
    w1b = pad2(w1[:, half:], S, S)
    w1_fwd = jnp.concatenate([w1a, w1b], axis=1)              # (S, 2S)
    w1_bwd = jnp.concatenate([w1b, -w1a], axis=1)             # (S, 2S), neg folded
    w1p = jnp.stack([w1_fwd, w1_bwd]).astype(bf16)            # (2, S, 2S)

    biases = jnp.stack([pad1(params["bf1"], S), pad1(params["bf2"], S),
                        pad1(params["b1"], S), pad1(params["b2"], S)])
    biases = biases.reshape(4, 1, S).astype(f32)              # (4, 1, S)

    # ---- pack state into a lane-aligned [x1 | x2] slab, bf16 ----
    xs = jnp.concatenate(
        [jnp.pad(state[:, :half].astype(f32), ((0, 0), (0, S - half))),
         jnp.pad(state[:, half:].astype(f32), ((0, 0), (0, S - half)))], axis=1)

    # ---- batch tiling: pad to sublane multiple, prefer >=2 parallel steps ----
    B8 = _round_up(B, 8)
    if block_batch is not None:
        bm = _round_up(min(block_batch, B8), 8)
    elif B8 <= 16:
        bm = B8
    else:
        bm = min(2048, _round_up((B8 + 1) // 2, 8))
    Bp = _round_up(B8, bm)
    xs = jnp.pad(xs, ((0, Bp - B), (0, 0))).astype(bf16)
    grid = (Bp // bm,)

    weight_specs = [
        pl.BlockSpec((4, S, S), lambda i: (0, 0, 0)),
        pl.BlockSpec((2, S, 2 * S), lambda i: (0, 0, 0)),
        pl.BlockSpec((4, 1, S), lambda i: (0, 0, 0)),
    ]
    cost = pl.CostEstimate(
        flops=int(Bp) * 16 * S * S,
        transcendentals=int(Bp) * 3 * S,
        bytes_accessed=int(Bp * 2 * S * (2 + 4)
                           + (int(sq.size) + int(w1p.size)) * 2
                           + int(biases.size) * 4),
    )

    out = pl.pallas_call(
        functools.partial(hamiltonian_inn_kernel, reverse=reverse, S=S),
        out_shape=jax.ShapeDtypeStruct((Bp, 2 * S), jnp.float32),
        grid=grid,
        in_specs=[pl.BlockSpec((bm, 2 * S), lambda i: (i, 0))] + weight_specs,
        out_specs=pl.BlockSpec((bm, 2 * S), lambda i: (i, 0)),
        scratch_shapes=[pltpu.VMEM((bm, 2 * S), jnp.bfloat16)],
        compiler_params=pltpu.CompilerParams(
            dimension_semantics=("parallel",)),
        cost_estimate=cost,
    )(xs, sq, w1p, biases)

    # out = [dp_dt (padded) | -dq_dt (padded)] -> slice back to (B, D)
    return jnp.concatenate([out[:B, :half], out[:B, S:S + half]], axis=1)


def init_params(key, input_dim, hidden_dim=64):
    """Deterministic synthetic init (PyTorch Linear-style uniform fan-in scaling)."""
    half = input_dim // 2
    ks = jax.random.split(key, 5)

    def lin(k, out_d, in_d):
        scale = 1.0 / jnp.sqrt(jnp.float32(in_d))
        kw, kb = jax.random.split(k)
        w = jax.random.uniform(kw, (out_d, in_d), jnp.float32, -scale, scale)
        b = jax.random.uniform(kb, (out_d,), jnp.float32, -scale, scale)
        return w, b

    wf1, bf1 = lin(ks[0], half, half)
    wf2, bf2 = lin(ks[1], half, half)
    w1, b1 = lin(ks[2], hidden_dim, input_dim)
    w2, b2 = lin(ks[3], hidden_dim, hidden_dim)
    w3, b3 = lin(ks[4], 1, hidden_dim)
    return dict(wf1=wf1, bf1=bf1, wf2=wf2, bf2=bf2,
                w1=w1, b1=b1, w2=w2, b2=b2, w3=w3, b3=b3)


def reference_forward(state, params, reverse=False):
    """Pure-JAX f32 reference using jax.grad (mirrors torch autograd semantics)."""
    half = state.shape[-1] // 2
    x1, x2 = state[:, :half], state[:, half:]
    h = jnp.tanh(x1 @ params["wf1"].T + params["bf1"])
    fx1 = h @ params["wf2"].T + params["bf2"]
    x2 = x2 - fx1 if reverse else x2 + fx1
    x = jnp.concatenate([x1, x2], axis=-1)

    def H_sum(xx):
        h1 = jnp.tanh(xx @ params["w1"].T + params["b1"])
        h2 = jnp.tanh(h1 @ params["w2"].T + params["b2"])
        return (h2 @ params["w3"].T + params["b3"]).sum()

    g = jax.grad(H_sum)(x)
    dq, dp = g[:, :half], g[:, half:]
    return jnp.concatenate([dp, -dq], axis=-1)


if __name__ == "__main__":
    key = jax.random.PRNGKey(0)
    k1, k2, k3, k4 = jax.random.split(key, 4)

    # Case 1: lane-aligned natural size (half = 128, default hidden_dim = 64),
    # batch tiled into 2 parallel grid steps.
    params = init_params(k1, 256)
    state = jax.random.normal(k2, (256, 256), dtype=jnp.float32)
    out_fwd = jax.block_until_ready(hamiltonian_inn_forward(state, params, reverse=False))
    out_rev = jax.block_until_ready(hamiltonian_inn_forward(state, params, reverse=True))
    ref_fwd = reference_forward(state, params, reverse=False)
    ref_rev = reference_forward(state, params, reverse=True)
    assert out_fwd.shape == state.shape
    # bf16 matmul operands -> tolerance loosened vs. pure-f32 path.
    assert jnp.allclose(out_fwd, ref_fwd, atol=1e-2, rtol=1e-2), "forward mismatch (case 1)"
    assert jnp.allclose(out_rev, ref_rev, atol=1e-2, rtol=1e-2), "reverse mismatch (case 1)"

    # Case 2: small, unaligned shapes — exercises the D/batch padding path.
    params_s = init_params(k3, 8)
    state_s = jax.random.normal(k4, (6, 8), dtype=jnp.float32)
    out_s = jax.block_until_ready(hamiltonian_inn_forward(state_s, params_s, reverse=False))
    ref_s = reference_forward(state_s, params_s, reverse=False)
    assert out_s.shape == state_s.shape
    assert jnp.allclose(out_s, ref_s, atol=1e-2, rtol=1e-2), "forward mismatch (case 2)"

    print("KERNEL_OK")
</pallas_src>

<mosaic_0001>
module attributes {stable_mosaic.version = 11 : i64} {
  func.func @hamiltonian_inn_kernel(%arg0: i32, %arg1: memref<128x256xbf16, #tpu.memory_space<vmem>>, %arg2: memref<4x128x128xbf16, #tpu.memory_space<vmem>>, %arg3: memref<2x128x256xbf16, #tpu.memory_space<vmem>>, %arg4: memref<4x1x128xf32, #tpu.memory_space<vmem>>, %arg5: memref<128x256xf32, #tpu.memory_space<vmem>>, %arg6: memref<128x256xbf16, #tpu.memory_space<vmem>>) attributes {dimension_semantics = [#tpu.dimension_semantics<parallel>], iteration_bounds = array<i64: 2>, scalar_prefetch = 0 : i64, scratch_operands = 1 : i64, tpu.core_type = #tpu.core_type<tc>, window_params = [{transform_indices = @transform_0, window_bounds = array<i64: 128, 256>}, {pipeline_mode = #tpu.pipeline_mode<synchronous>, transform_indices = @transform_1, window_bounds = array<i64: 4, 128, 128>}, {pipeline_mode = #tpu.pipeline_mode<synchronous>, transform_indices = @transform_2, window_bounds = array<i64: 2, 128, 256>}, {pipeline_mode = #tpu.pipeline_mode<synchronous>, transform_indices = @transform_3, window_bounds = array<i64: 4, 1, 128>}, {transform_indices = @transform_4, window_bounds = array<i64: 128, 256>}]} {
    %c0 = arith.constant 0 : index
    %c0_0 = arith.constant 0 : index
    %0 = vector.load %arg1[%c0, %c0_0] : memref<128x256xbf16, #tpu.memory_space<vmem>>, vector<128x256xbf16>
    %1 = vector.extract_strided_slice %0 {offsets = [0, 0], sizes = [128, 128], strides = [1, 1]} : vector<128x256xbf16> to vector<128x128xbf16>
    %2 = vector.extract_strided_slice %0 {offsets = [0, 128], sizes = [128, 128], strides = [1, 1]} : vector<128x256xbf16> to vector<128x128xbf16>
    %3 = arith.extf %2 : vector<128x128xbf16> to vector<128x128xf32>
    %c0_1 = arith.constant 0 : index
    %c0_2 = arith.constant 0 : index
    %c0_3 = arith.constant 0 : index
    %4 = vector.load %arg2[%c0_1, %c0_2, %c0_3] : memref<4x128x128xbf16, #tpu.memory_space<vmem>>, vector<1x128x128xbf16>
    %5 = vector.shape_cast %4 : vector<1x128x128xbf16> to vector<128x128xbf16>
    %cst = arith.constant dense<0.000000e+00> : vector<128x128xf32>
    %6 = tpu.matmul %1, %5, %cst {dimension_numbers = #tpu.dot_dimension_numbers<[1], [1], [0], [0], [0, 0, 1, 0], [], []>} : vector<128x128xbf16>, vector<128x128xbf16>, vector<128x128xf32> -> vector<128x128xf32>
    %c0_4 = arith.constant 0 : index
    %c0_5 = arith.constant 0 : index
    %c0_6 = arith.constant 0 : index
    %7 = vector.load %arg4[%c0_4, %c0_5, %c0_6] : memref<4x1x128xf32, #tpu.memory_space<vmem>>, vector<1x1x128xf32>
    %8 = vector.shape_cast %7 : vector<1x1x128xf32> to vector<1x128xf32>
    %9 = vector.broadcast %8 : vector<1x128xf32> to vector<128x128xf32>
    %10 = arith.addf %6, %9 : vector<128x128xf32>
    %11 = math.tanh %10 : vector<128x128xf32>
    %12 = arith.truncf %11 : vector<128x128xf32> to vector<128x128xbf16>
    %c1 = arith.constant 1 : index
    %c0_7 = arith.constant 0 : index
    %c0_8 = arith.constant 0 : index
    %13 = vector.load %arg2[%c1, %c0_7, %c0_8] : memref<4x128x128xbf16, #tpu.memory_space<vmem>>, vector<1x128x128xbf16>
    %14 = vector.shape_cast %13 : vector<1x128x128xbf16> to vector<128x128xbf16>
    %cst_9 = arith.constant dense<0.000000e+00> : vector<128x128xf32>
    %15 = tpu.matmul %12, %14, %cst_9 {dimension_numbers = #tpu.dot_dimension_numbers<[1], [1], [0], [0], [0, 0, 1, 0], [], []>} : vector<128x128xbf16>, vector<128x128xbf16>, vector<128x128xf32> -> vector<128x128xf32>
    %c1_10 = arith.constant 1 : index
    %c0_11 = arith.constant 0 : index
    %c0_12 = arith.constant 0 : index
    %16 = vector.load %arg4[%c1_10, %c0_11, %c0_12] : memref<4x1x128xf32, #tpu.memory_space<vmem>>, vector<1x1x128xf32>
    %17 = vector.shape_cast %16 : vector<1x1x128xf32> to vector<1x128xf32>
    %18 = vector.broadcast %17 : vector<1x128xf32> to vector<128x128xf32>
    %19 = arith.addf %15, %18 : vector<128x128xf32>
    %20 = arith.addf %3, %19 : vector<128x128xf32>
    %c0_13 = arith.constant 0 : index
    %c0_14 = arith.constant 0 : index
    %21 = vector.load %arg6[%c0_13, %c0_14] : memref<128x256xbf16, #tpu.memory_space<vmem>>, vector<128x128xbf16>
    tpu.vector_store %arg6[%c0_13, %c0_14], %1 {strides = array<i32>} : memref<128x256xbf16, #tpu.memory_space<vmem>>, vector<128x128xbf16>,
    %22 = arith.truncf %20 : vector<128x128xf32> to vector<128x128xbf16>
    %c0_15 = arith.constant 0 : index
    %c128 = arith.constant 128 : index
    %23 = vector.load %arg6[%c0_15, %c128] : memref<128x256xbf16, #tpu.memory_space<vmem>>, vector<128x128xbf16>
    tpu.vector_store %arg6[%c0_15, %c128], %22 {strides = array<i32>} : memref<128x256xbf16, #tpu.memory_space<vmem>>, vector<128x128xbf16>,
    %c0_16 = arith.constant 0 : index
    %c0_17 = arith.constant 0 : index
    %24 = vector.load %arg6[%c0_16, %c0_17] : memref<128x256xbf16, #tpu.memory_space<vmem>>, vector<128x256xbf16>
    %c0_18 = arith.constant 0 : index
    %c0_19 = arith.constant 0 : index
    %c0_20 = arith.constant 0 : index
    %25 = vector.load %arg3[%c0_18, %c0_19, %c0_20] : memref<2x128x256xbf16, #tpu.memory_space<vmem>>, vector<1x128x256xbf16>
    %26 = vector.shape_cast %25 : vector<1x128x256xbf16> to vector<128x256xbf16>
    %cst_21 = arith.constant dense<0.000000e+00> : vector<128x128xf32>
    %27 = tpu.matmul %24, %26, %cst_21 {dimension_numbers = #tpu.dot_dimension_numbers<[1], [1], [0], [0], [0, 0, 1, 0], [], []>} : vector<128x256xbf16>, vector<128x256xbf16>, vector<128x128xf32> -> vector<128x128xf32>
    %c2 = arith.constant 2 : index
    %c0_22 = arith.constant 0 : index
    %c0_23 = arith.constant 0 : index
    %28 = vector.load %arg4[%c2, %c0_22, %c0_23] : memref<4x1x128xf32, #tpu.memory_space<vmem>>, vector<1x1x128xf32>
    %29 = vector.shape_cast %28 : vector<1x1x128xf32> to vector<1x128xf32>
    %30 = vector.broadcast %29 : vector<1x128xf32> to vector<128x128xf32>
    %31 = arith.addf %27, %30 : vector<128x128xf32>
    %32 = math.tanh %31 : vector<128x128xf32>
    %33 = arith.truncf %32 : vector<128x128xf32> to vector<128x128xbf16>
    %c2_24 = arith.constant 2 : index
    %c0_25 = arith.constant 0 : index
    %c0_26 = arith.constant 0 : index
    %34 = vector.load %arg2[%c2_24, %c0_25, %c0_26] : memref<4x128x128xbf16, #tpu.memory_space<vmem>>, vector<1x128x128xbf16>
    %35 = vector.shape_cast %34 : vector<1x128x128xbf16> to vector<128x128xbf16>
    %cst_27 = arith.constant dense<0.000000e+00> : vector<128x128xf32>
    %36 = tpu.matmul %33, %35, %cst_27 {dimension_numbers = #tpu.dot_dimension_numbers<[1], [1], [0], [0], [0, 0, 1, 0], [], []>} : vector<128x128xbf16>, vector<128x128xbf16>, vector<128x128xf32> -> vector<128x128xf32>
    %c3 = arith.constant 3 : index
    %c0_28 = arith.constant 0 : index
    %c0_29 = arith.constant 0 : index
    %37 = vector.load %arg4[%c3, %c0_28, %c0_29] : memref<4x1x128xf32, #tpu.memory_space<vmem>>, vector<1x1x128xf32>
    %38 = vector.shape_cast %37 : vector<1x1x128xf32> to vector<1x128xf32>
    %39 = vector.broadcast %38 : vector<1x128xf32> to vector<128x128xf32>
    %40 = arith.addf %36, %39 : vector<128x128xf32>
    %41 = math.tanh %40 : vector<128x128xf32>
    %42 = arith.mulf %41, %41 : vector<128x128xf32>
    %cst_30 = arith.constant 1.000000e+00 : f32
    %43 = vector.broadcast %cst_30 : f32 to vector<128x128xf32>
    %44 = arith.subf %43, %42 : vector<128x128xf32>
    %45 = arith.truncf %44 : vector<128x128xf32> to vector<128x128xbf16>
    %c3_31 = arith.constant 3 : index
    %c0_32 = arith.constant 0 : index
    %c0_33 = arith.constant 0 : index
    %46 = vector.load %arg2[%c3_31, %c0_32, %c0_33] : memref<4x128x128xbf16, #tpu.memory_space<vmem>>, vector<1x128x128xbf16>
    %47 = vector.shape_cast %46 : vector<1x128x128xbf16> to vector<128x128xbf16>
    %cst_34 = arith.constant dense<0.000000e+00> : vector<128x128xf32>
    %48 = tpu.matmul %45, %47, %cst_34 {dimension_numbers = #tpu.dot_dimension_numbers<[1], [0], [0], [1], [0, 0, 1, 1], [], []>} : vector<128x128xbf16>, vector<128x128xbf16>, vector<128x128xf32> -> vector<128x128xf32>
    %49 = arith.mulf %32, %32 : vector<128x128xf32>
    %cst_35 = arith.constant 1.000000e+00 : f32
    %50 = vector.broadcast %cst_35 : f32 to vector<128x128xf32>
    %51 = arith.subf %50, %49 : vector<128x128xf32>
    %52 = arith.mulf %48, %51 : vector<128x128xf32>
    %53 = arith.truncf %52 : vector<128x128xf32> to vector<128x128xbf16>
    %c1_36 = arith.constant 1 : index
    %c0_37 = arith.constant 0 : index
    %c0_38 = arith.constant 0 : index
    %54 = vector.load %arg3[%c1_36, %c0_37, %c0_38] : memref<2x128x256xbf16, #tpu.memory_space<vmem>>, vector<1x128x256xbf16>
    %55 = vector.shape_cast %54 : vector<1x128x256xbf16> to vector<128x256xbf16>
    %cst_39 = arith.constant dense<0.000000e+00> : vector<128x256xf32>
    %56 = tpu.matmul %53, %55, %cst_39 {dimension_numbers = #tpu.dot_dimension_numbers<[1], [0], [0], [1], [0, 0, 1, 1], [], []>} : vector<128x128xbf16>, vector<128x256xbf16>, vector<128x256xf32> -> vector<128x256xf32>
    %c0_40 = arith.constant 0 : index
    %c0_41 = arith.constant 0 : index
    %57 = vector.load %arg5[%c0_40, %c0_41] : memref<128x256xf32, #tpu.memory_space<vmem>>, vector<128x256xf32>
    tpu.vector_store %arg5[%c0_40, %c0_41], %56 {strides = array<i32>} : memref<128x256xf32, #tpu.memory_space<vmem>>, vector<128x256xf32>,
    return
  }
  func.func @transform_0(%arg0: i32) -> (i32, i32) {
    %c0_i32 = arith.constant 0 : i32
    %c0_i32_0 = arith.constant 0 : i32
    return %arg0, %c0_i32 : i32, i32
  }
  func.func @transform_1(%arg0: i32) -> (i32, i32, i32) {
    %c0_i32 = arith.constant 0 : i32
    %c0_i32_0 = arith.constant 0 : i32
    %c0_i32_1 = arith.constant 0 : i32
    %c0_i32_2 = arith.constant 0 : i32
    return %c0_i32, %c0_i32_0, %c0_i32_1 : i32, i32, i32
  }
  func.func @transform_2(%arg0: i32) -> (i32, i32, i32) {
    %c0_i32 = arith.constant 0 : i32
    %c0_i32_0 = arith.constant 0 : i32
    %c0_i32_1 = arith.constant 0 : i32
    %c0_i32_2 = arith.constant 0 : i32
    return %c0_i32, %c0_i32_0, %c0_i32_1 : i32, i32, i32
  }
  func.func @transform_3(%arg0: i32) -> (i32, i32, i32) {
    %c0_i32 = arith.constant 0 : i32
    %c0_i32_0 = arith.constant 0 : i32
    %c0_i32_1 = arith.constant 0 : i32
    %c0_i32_2 = arith.constant 0 : i32
    return %c0_i32, %c0_i32_0, %c0_i32_1 : i32, i32, i32
  }
  func.func @transform_4(%arg0: i32) -> (i32, i32) {
    %c0_i32 = arith.constant 0 : i32
    %c0_i32_0 = arith.constant 0 : i32
    return %arg0, %c0_i32 : i32, i32
  }
}

</mosaic_0001>

<bundles_post_ra>
// kernel: tpu_custom_call.1
= control target key start
LH: loop header
LB: loop body
LE: loop exit
PB: predicated region body
PF: predicated region fallthrough
CT: control target
= control target key end

     0   :  { %9 = vsyncpa [#allocation4], 0  ;;  %s3302_s0 = inlined_call_operand.hbm [shape: bf16[256,256], index: 0, kind: input, shape index: {}]   ;;  %s3303_s1 = inlined_call_operand.hbm [shape: bf16[4,128,128], index: 1, kind: input, shape index: {}]   ;;  %s3304_s2 = inlined_call_operand.hbm [shape: bf16[2,128,256], index: 2, kind: input, shape index: {}]   ;;  %s3305_s3 = inlined_call_operand.vmem [shape: f32[4,1,128], index: 3, kind: input, shape index: {}]   ;;  %s3306_s4 = inlined_call_operand.hbm [shape: f32[256,256], index: 4, kind: output, shape index: {}]  }
   0x1   :  { %11 = vsyncpa [#allocation4 + $0x1], 0 }
   0x2   :  { %12 = vsyncpa [#allocation7], 0 }
   0x3   :  { %13 = vsyncpa [#allocation5], 0 }
   0x4   :  { %15 = vsyncpa [#allocation5 + $0x1], 0  ;;  %s2776_s15 = smov 0   ;;  %s2778_s16 = smov 0  }
   0x5   :  { %s2780_s17 = smov 0   ;;  %s2782_s18 = smov 0  }
   0x6 LB: > { %s2797_s19 = sadd.s32 4294967295, %s2738_s18   ;;  %s1949_s20 = sadd.s32 4294967294, %s2738_s18   ;;  %s2738_s18 = sphi %s2782_s18, %s3328_s18   ;;  %s2734_s17 = sphi %s2780_s17, %s3327_s17   ;;  %s2730_s16 = sphi %s2778_s16, %s3326_s16   ;;  %s2726_s15 = sphi %s2776_s15, %s3325_s15  }
   0x7   : > { %p41_p0 = scmp.ne.s32.totalorder %s2730_s16, %s2726_s15  ;;  %p3307_p1 = scmp.eq.s32.totalorder %s2797_s19, 0 }
   0x8   : > { %p134_p3 = scmp.eq.s32.totalorder %s1949_s20, 1  ;;  %p1950_p5 = scmp.ge.s32.totalorder %s2738_s18, 1 }
   0x9   : > { %p2806_p4 = por %p3307_p1, %p41_p0  ;;  %p141_p7 = scmp.lt.s32.totalorder %s2738_s18, 3 }
   0xa   : > { %p2811_p6 = por %p134_p3, %p41_p0  ;;  %s2740_s24 = smov [#allocation6]  }
   0xb   : > { %s3311_s21 = scalar_select %p2806_p4, 1, 0 }
   0xc   : > { %s3312_s22 = scalar_select %p2811_p6, 1, 0 }
   0xd   : > { %p2816_p8 = pnand %p1950_p5, %p141_p7  ;;  %s153_s25 = sshll.u32 %s2740_s24, 4  ;;  %s154_s25 = int_to_ptr.vmem [resolvable:$true] %s153_s25 }
   0xe   : > { %s2741_s27 = smov [#allocation8]   ;;  %s2601_s29 = scalar_lea.vmem %s154_s25, 4096 }
   0xf   : > { %s3313_s23 = scalar_select %p2816_p8, 1, 0 }
  0x10   : > { %p2320_p9 = pneg %p2816_p8  ;;  %s166_s28 = sshll.u32 %s2741_s27, 4  ;;  %s167_s28 = int_to_ptr.vmem [resolvable:$true] %s166_s28 }
  0x11   : > { %p2602_p13 = scmp.ne.s32.totalorder %s154_s25, %s2601_s29  ;;  %p2609_p5 = scmp.lt.s32.totalorder %s154_s25, %s154_s25 }
  0x12   : > { %p2825_p11 = pnand %p2320_p9, %p3307_p1  ;;  %p2610_p7 = scmp.lt.s32.totalorder %s2601_s29, %s2601_s29 }
  0x14   : > { %p2592_p12 = pneg %p2825_p11  ;;  %p2611_p10 = por %p2610_p7, %p2609_p5 }
  0x16   : > { %p2604_p0 = pnand %p2602_p13, %p2592_p12 }
  0x18   : > { %p2605_p3 = pneg %p2604_p0 }
  0x1a   : > { %p2612_p9 = pnand %p2611_p10, %p2605_p3 }
  0x1c   : > { %2615 = shalt.err (!%p2612_p9)
}
  0x1d   : > { %s2742_s30 = smov 64   ;;  %s2743_s5 = smov 4  }
  0x1e   : > { %2323 = dma.hbm_to_vmem [thread:$0]  (!%p2825_p11), %s3303_s1, 4096, %s154_s25, [#allocation7], %s2742_s30, %s2742_s30, %s2743_s5  }
  0x1f   : > { %s2627_s8 = scalar_lea.vmem %s167_s28, 4096  ;;  %p2635_p2 = scmp.lt.s32.totalorder %s167_s28, %s167_s28 }
  0x20   : > { %p2628_p1 = scmp.ne.s32.totalorder %s167_s28, %s2627_s8  ;;  %p2636_p6 = scmp.lt.s32.totalorder %s2627_s8, %s2627_s8 }
  0x22   : > { %p2630_p13 = pnand %p2628_p1, %p2592_p12  ;;  %p2637_p5 = por %p2636_p6, %p2635_p2 }
  0x24   : > { %p2631_p0 = pneg %p2630_p13 }
  0x26   : > { %p2638_p10 = pnand %p2637_p5, %p2631_p0 }
  0x28   : > { %2641 = shalt.err (!%p2638_p10)
}
  0x29   : > { %s2744_s9 = smov 128   ;;  %s2745_s10 = smov 8  }
  0x2a   : > { %2326 = dma.hbm_to_vmem [thread:$0]  (!%p2825_p11), %s3304_s2, 4096, %s167_s28, [#allocation7], %s2744_s9, %s2744_s9, %s2745_s10  }
  0x2b   : > { %s2851_s13 = sadd.s32 1, %s2738_s18   ;;  %s28_s20 = sadd.s32 1, %s2734_s17 }
  0x2c   : > { %s25_s14 = ssub.s32 %s2738_s18, %s2851_s13  ;;  %p35_p2 = scmp.ne.s32.totalorder %s2734_s17, %s2730_s16 }
  0x2d   : > { %p26_p1 = scmp.eq.s32.totalorder %s25_s14, 0  ;;  %p36_p6 = scmp.eq.s32.totalorder %s2738_s18, 0 }
  0x2e   : > { %p3315_p3 = scmp.eq.s32.totalorder %s2797_s19, 1  ;;  %p2337_p9 = scmp.lt.s32.totalorder %s2738_s18, 2 }
  0x2f   : > { %s2860_s24 = scalar_select %p26_p1, %s2734_s17, %s28_s20  }
  0x30   : > { %p37_p12 = por %p36_p6, %p35_p2  ;;  %p2864_p7 = por %p3315_p3, %p35_p2 }
  0x31   : > { %s183_s26 = sand.u32 1, %s2734_s17   ;;  %s2081_s28 = sshll.u32 %s2738_s18, 11 }
  0x32   : > { %s3316_s25 = scalar_select %p2864_p7, 1, 0 }
  0x33   : > { %s1954_s27 = sshll.u32 %s183_s26, 7  ;;  %s2874_s5 = scalar_lea.hbm %s3302_s0, %s2081_s28 }
  0x34   : > { %s187_s6 = scalar_lea.vmem [#allocation3], %s1954_s27  ;;  %p2878_p11 = pnand %p2337_p9, %p37_p12 }
  0x35   : > { %s195_s7 = sshll.u32 %s187_s6, 4  ;;  %s2882_s11 = scalar_lea.sflag [#allocation4], %s183_s26  ;;  %s2876_s7 = int_to_ptr.vmem [resolvable:$true] %s195_s7 }
  0x36   : > { %s2642_s12 = scalar_lea.hbm %s2874_s5, 2048  ;;  %p2644_p0 = pneg %p2878_p11 }
  0x37   : > { %p2643_p13 = scmp.ne.s32.totalorder %s2874_s5, %s2642_s12  ;;  %s2647_s27 = scalar_lea.hbm %s3302_s0, 4096 }
  0x38   : > { %p2648_p1 = scmp.lt.s32.totalorder %s2874_s5, %s3302_s0  ;;  %p2649_p2 = scmp.lt.s32.totalorder %s2647_s27, %s2642_s12 }
  0x39   : > { %p2645_p5 = pnand %p2644_p0, %p2643_p13 }
  0x3a   : > { %p2650_p6 = por %p2649_p2, %p2648_p1 }
  0x3b   : > { %p2646_p10 = pneg %p2645_p5 }
  0x3d   : > { %p2651_p12 = pnand %p2650_p6, %p2646_p10 }
  0x3f   : > { %2654 = shalt.err (!%p2651_p12)
}
  0x40   : > { %s2655_s26 = scalar_lea.vmem %s2876_s7, 2048  ;;  %s2746_s30 = smov [#allocation3]  }
  0x41   : > { %p2656_p3 = scmp.ne.s32.totalorder %s2876_s7, %s2655_s26  ;;  %s2660_s6 = sshll.u32 %s2746_s30, 4  ;;  %s2661_s6 = int_to_ptr.vmem [resolvable:$false] %s2660_s6 }
  0x42   : > { %s2662_s14 = scalar_lea.vmem %s2661_s6, 4096  ;;  %p2663_p5 = scmp.lt.s32.totalorder %s2876_s7, %s2661_s6 }
  0x43   : > { %p2658_p9 = pnand %p2656_p3, %p2644_p0  ;;  %p2664_p7 = scmp.lt.s32.totalorder %s2662_s14, %s2655_s26 }
  0x45   : > { %p2659_p13 = pneg %p2658_p9  ;;  %p2665_p4 = por %p2664_p7, %p2663_p5 }
  0x47   : > { %p2666_p8 = pnand %p2665_p4, %p2659_p13 }
  0x49   : > { %2669 = shalt.err (!%p2666_p8)
}
  0x4a   : > { %2330 = dma.hbm_to_vmem [thread:$0]  (!%p2878_p11), %s2874_s5, 2048, %s2876_s7, %s2882_s11, %s2744_s9, %s2744_s9, %s2745_s10  }
  0x4b   : > { %p3318_p0 = scmp.ne.s32.totalorder %s3313_s23, 0 }
  0x4c   : > { %s2909_s12 = sand.u32 (!%p3318_p0), 1, %s2730_s16   ;;  %p3319_p4 = scmp.ne.s32.totalorder (!%p3318_p0), %s3311_s21, 0 }
  0x4d   : > { %207 = sbr.rel (%p3318_p0) target bundleno = 1500 (0x5dc), region = 36  ;;  %s1959_s20 = sshll.u32 (!%p3318_p0), %s2909_s12, 7 }
  0x4e   : > { %s210_s27 = scalar_lea.sflag (!%p3318_p0), [#allocation4], %s2909_s12  ;;  %s2913_s28 = scalar_lea.vmem (!%p3318_p0), [#allocation3], %s1959_s20 }
  0x52   : > { %2713 = dma.done.wait (%p3319_p4), %s210_s27, 2048  }
  0x53   : > { %2715 = vsyncadd (%p3319_p4), %s210_s27, 4294965248  ;;  %p3320_p8 = scmp.eq.s32.totalorder %s2797_s19, 0 }
  0x55   : > { %2717 = dma.done.wait (%p3320_p8), [#allocation7], 8192   ;;  %p3321_p7 = pmov %p3320_p8 }
  0x56   : > { %v2382_v0 = vld [vmem:[#allocation6 + $0x38] sm:$0xff]   ;;  %v2383_v1 = vld [vmem:[#allocation6 + $0x30] sm:$0xff]   ;;  %v2384_v2 = vld [vmem:[#allocation6 + $0x28] sm:$0xff]   ;;  %s1962_s29 = sshll.u32 %s2909_s12, 8  ;;  %s2099_s30 = sshll.u32 %s2797_s19, 12 }
  0x57   : > { %2719 = vsyncadd (%p3321_p7), [#allocation7], 4294959104  ;;  %2164 = vmatprep.subr.bf16.mxu0 %v2382_v0  ;;  %v2924_v3 = vld [vmem:[%s2913_s28] sm:$0xff]  ;;  %v2927_v4 = vld [vmem:[%s2913_s28 + $0x8] sm:$0xff]  ;;  %s3218_s26 = scalar_lea.vmem [#allocation9], %s1962_s29  ;;  %s3255_s27 = scalar_lea.hbm %s3306_s4, %s2099_s30 }
  0x58   : > { %2165 = vmatpush3.bf16.xpose.msra.mxu0 %v2382_v0  ;;  %v2930_v5 = vld [vmem:[%s2913_s28 + $0x10] sm:$0xff]  ;;  %v1964_v6 = vcombine.low %v2924_v3, %v2927_v4  ;;  %739 = vst [vmem:[#allocation2] sm:$0xf] %v2924_v3  ;;  %740 = vst [vmem:[#allocation2 + $0x8] sm:$0xf] %v2927_v4  ;;  %v2937_v7 = vld [vmem:[%s2913_s28 + $0x18] sm:$0xff] }
  0x59   : > { %2166 = vmatprep.subr.bf16.mxu0 %v2383_v1  ;;  %741 = vst [vmem:[#allocation2 + $0x10] sm:$0xf] %v2930_v5  ;;  %v2941_v8 = vld [vmem:[%s2913_s28 + $0x20] sm:$0xff]  ;;  %v2944_v9 = vld [vmem:[%s2913_s28 + $0x28] sm:$0xff]  ;;  %742 = vst [vmem:[#allocation2 + $0x18] sm:$0xf] %v2937_v7  ;;  %v1965_v30 = vcombine.low %v2930_v5, %v2937_v7 }
  0x5a   : > { %743 = vst [vmem:[#allocation2 + $0x20] sm:$0xf] %v2941_v8  ;;  %744 = vst [vmem:[#allocation2 + $0x28] sm:$0xf] %v2944_v9  ;;  %v2950_v10 = vld [vmem:[%s2913_s28 + $0x30] sm:$0xff]  ;;  %v2953_v11 = vld [vmem:[%s2913_s28 + $0x38] sm:$0xff]  ;;  %2180 = vmatprep.mubr.bf16.mxu0 %v1964_v6  ;;  %v1966_v31 = vcombine.low %v2941_v8, %v2944_v9 }
  0x5b   : > { %v2956_v12 = vld [vmem:[%s2913_s28 + $0x40] sm:$0xff]  ;;  %745 = vst [vmem:[#allocation2 + $0x30] sm:$0xf] %v2950_v10  ;;  %746 = vst [vmem:[#allocation2 + $0x38] sm:$0xf] %v2953_v11  ;;  %v2961_v13 = vld [vmem:[%s2913_s28 + $0x48] sm:$0xff]  ;;  %v1967_v32 = vcombine.low %v2950_v10, %v2953_v11 }
  0x5c   : > { %747 = vst [vmem:[#allocation2 + $0x40] sm:$0xf] %v2956_v12  ;;  %v2965_v14 = vld [vmem:[%s2913_s28 + $0x50] sm:$0xff]  ;;  %v2968_v15 = vld [vmem:[%s2913_s28 + $0x58] sm:$0xff]  ;;  %748 = vst [vmem:[#allocation2 + $0x48] sm:$0xf] %v2961_v13  ;;  %v1968_v33 = vcombine.low %v2956_v12, %v2961_v13 }
  0x5d   : > { %749 = vst [vmem:[#allocation2 + $0x50] sm:$0xf] %v2965_v14  ;;  %750 = vst [vmem:[#allocation2 + $0x58] sm:$0xf] %v2968_v15  ;;  %v2974_v16 = vld [vmem:[%s2913_s28 + $0x60] sm:$0xff]  ;;  %v2977_v17 = vld [vmem:[%s2913_s28 + $0x68] sm:$0xff]  ;;  %v1969_v34 = vcombine.low %v2965_v14, %v2968_v15 }
  0x5e   : > { %v2980_v18 = vld [vmem:[%s2913_s28 + $0x70] sm:$0xff]  ;;  %751 = vst [vmem:[#allocation2 + $0x60] sm:$0xf] %v2974_v16  ;;  %752 = vst [vmem:[#allocation2 + $0x68] sm:$0xf] %v2977_v17  ;;  %v2985_v19 = vld [vmem:[%s2913_s28 + $0x78] sm:$0xff]  ;;  %v1970_v35 = vcombine.low %v2974_v16, %v2977_v17 }
  0x5f   : > { %753 = vst [vmem:[#allocation2 + $0x70] sm:$0xf] %v2980_v18  ;;  %754 = vst [vmem:[#allocation2 + $0x78] sm:$0xf] %v2985_v19  ;;  %v2398_v20 = vld [vmem:[#allocation6 + $0x78] sm:$0xff]   ;;  %v2399_v21 = vld [vmem:[#allocation6 + $0x70] sm:$0xff]   ;;  %v1971_v36 = vcombine.low %v2980_v18, %v2985_v19 }
  0x60   : > { %2167 = vmatpush3.bf16.xpose.msra.mxu0 %v2383_v1  ;;  %v2385_v22 = vld [vmem:[#allocation6 + $0x20] sm:$0xff]   ;;  %2196 = vmatprep.subr.bf16.mxu1 %v2398_v20  ;;  %v2400_v23 = vld [vmem:[#allocation6 + $0x68] sm:$0xff]   ;;  %v2386_v24 = vld [vmem:[#allocation6 + $0x18] sm:$0xff]   ;;  %s1857_s6 = sshll.u32 %s3218_s26, 4  ;;  %s1843_s28 = scalar_lea.sflag [#allocation5], %s2909_s12  ;;  %s3257_s6 = int_to_ptr.vmem [resolvable:$true] %s1857_s6 }
  0x61   : > { %2168 = vmatprep.subr.bf16.mxu0 %v2384_v2  ;;  %2197 = vmatpush3.bf16.xpose.msra.mxu1 %v2398_v20  ;;  %v2401_v25 = vld [vmem:[#allocation6 + $0x60] sm:$0xff]   ;;  %v2387_v26 = vld [vmem:[#allocation6 + $0x10] sm:$0xff]   ;;  %v2402_v27 = vld [vmem:[#allocation6 + $0x58] sm:$0xff]   ;;  %s2670_s21 = scalar_lea.vmem %s3257_s6, 4096  ;;  %p3322_p10 = scmp.ne.s32.totalorder %s3316_s25, 0 }
  0x62   : > { %2198 = vmatprep.subr.bf16.mxu1 %v2399_v21  ;;  %v2388_v28 = vld [vmem:[#allocation6 + $0x8] sm:$0xff]   ;;  %v2389_v29 = vld [vmem:[#allocation6] sm:$0xff]   ;;  %v2403_v37 = vld [vmem:[#allocation6 + $0x50] sm:$0xff]   ;;  %p2671_p11 = scmp.ne.s32.totalorder %s3257_s6, %s2670_s21  ;;  %s2748_s19 = smov [#allocation9]  }
  0x63   : > { %v2404_v38 = vld [vmem:[#allocation6 + $0x48] sm:$0xff]   ;;  %v2405_v39 = vld [vmem:[#allocation6 + $0x40] sm:$0xff]   ;;  %v2406_v40 = vld [vmem:[#allocation8 + $0x70] ss:$8 sps:$4 sm:$0xff]   ;;  %s2674_s23 = sshll.u32 %s2748_s19, 4  ;;  %s2675_s23 = int_to_ptr.vmem [resolvable:$false] %s2674_s23 }
  0x64   : > { %v2408_v41 = vld [vmem:[#allocation8 + $0x74] ss:$8 sps:$4 sm:$0xff]   ;;  %v2411_v42 = vld [vmem:[#allocation8 + $0x64] ss:$8 sps:$4 sm:$0xff]   ;;  %v2409_v43 = vld [vmem:[#allocation8 + $0x60] ss:$8 sps:$4 sm:$0xff]   ;;  %p2672_p1 = pnand %p2671_p11, %p3322_p10  ;;  %p2677_p6 = scmp.lt.s32.totalorder %s3257_s6, %s2675_s23 }
  0x65   : > { %v2414_v44 = vld [vmem:[#allocation8 + $0x54] ss:$8 sps:$4 sm:$0xff]   ;;  %v2412_v45 = vld [vmem:[#allocation8 + $0x50] ss:$8 sps:$4 sm:$0xff]   ;;  %v2417_v46 = vld [vmem:[#allocation8 + $0x44] ss:$8 sps:$4 sm:$0xff]  }
  0x66   : > { %v2415_v47 = vld [vmem:[#allocation8 + $0x40] ss:$8 sps:$4 sm:$0xff]   ;;  %v2420_v48 = vld [vmem:[#allocation8 + $0x34] ss:$8 sps:$4 sm:$0xff]   ;;  %v2418_v49 = vld [vmem:[#allocation8 + $0x30] ss:$8 sps:$4 sm:$0xff]   ;;  %p2673_p2 = pneg %p2672_p1 }
  0x67   : > { %v1963_v51 = vld [vmem:[%s3305_s3] ss:$0 sm:$0xff]  ;;  %s2676_s9 = scalar_lea.vmem %s2675_s23, 8192 }
  0x68   : > { %2169 = vmatpush3.bf16.xpose.msra.mxu0 %v2384_v2  ;;  %p2678_p12 = scmp.lt.s32.totalorder %s2676_s9, %s2670_s21 }
  0x69   : > { %2170 = vmatprep.subr.bf16.mxu0 %v2385_v22  ;;  %2199 = vmatpush3.bf16.xpose.msra.mxu1 %v2399_v21 }
  0x6a   : > { %2200 = vmatprep.subr.bf16.mxu1 %v2400_v23  ;;  %p2679_p3 = por %p2678_p12, %p2677_p6 }
  0x6c   : > { %p2680_p9 = pnand %p2679_p3, %p2673_p2 }
  0x70   : > { %2171 = vmatpush3.bf16.xpose.msra.mxu0 %v2385_v22 }
  0x71   : > { %2172 = vmatprep.subr.bf16.mxu0 %v2386_v24  ;;  %2201 = vmatpush3.bf16.xpose.msra.mxu1 %v2400_v23 }
  0x72   : > { %2202 = vmatprep.subr.bf16.mxu1 %v2401_v25 }
  0x78   : > { %2173 = vmatpush3.bf16.xpose.msra.mxu0 %v2386_v24 }
  0x79   : > { %2174 = vmatprep.subr.bf16.mxu0 %v2387_v26  ;;  %2203 = vmatpush3.bf16.xpose.msra.mxu1 %v2401_v25 }
  0x7a   : > { %2204 = vmatprep.subr.bf16.mxu1 %v2402_v27 }
  0x80   : > { %2175 = vmatpush3.bf16.xpose.msra.mxu0 %v2387_v26 }
  0x81   : > { %2176 = vmatprep.subr.bf16.mxu0 %v2388_v28  ;;  %2205 = vmatpush3.bf16.xpose.msra.mxu1 %v2402_v27 }
  0x82   : > { %2206 = vmatprep.subr.bf16.mxu1 %v2403_v37 }
  0x88   : > { %2177 = vmatpush3.bf16.xpose.msra.mxu0 %v2388_v28 }
  0x89   : > { %2178 = vmatprep.subr.bf16.mxu0 %v2389_v29  ;;  %2207 = vmatpush3.bf16.xpose.msra.mxu1 %v2403_v37 }
  0x8a   : > { %2208 = vmatprep.subr.bf16.mxu1 %v2404_v38 }
  0x90   : > { %2179 = vmatpush3.bf16.xpose.msra.mxu0 %v2389_v29 }
  0x91   : > { %2209 = vmatpush3.bf16.xpose.msra.mxu1 %v2404_v38  ;;  %1035 = vmatprep.subr.bf16.mxu0 %v2408_v41 }
  0x92   : > { %2210 = vmatprep.subr.bf16.mxu1 %v2405_v39 }
  0x97   : > { %2181 = vmatmul.mubr.bf16.vlgmr.msra.gmra.mxu0 %v1965_v30 }
  0x98   : > { %2184 = vmatprep.mubr.bf16.mxu0 %v1966_v31  ;;  %1036 = vmatpush1.bf16.xpose.msra.mxu0 %v2406_v40 }
  0x99   : > { %2211 = vmatpush3.bf16.xpose.msra.mxu1 %v2405_v39  ;;  %1037 = vmatprep.subr.bf16.mxu0 %v2411_v42 }
  0x9f   : > { %2185 = vmatmul.mubr.bf16.gmra.mxu0 %v1967_v32 }
  0xa0   : > { %2188 = vmatprep.mubr.bf16.mxu0 %v1968_v33  ;;  %1038 = vmatpush1.bf16.xpose.msra.mxu0 %v2409_v43 }
  0xa1   : > { %1039 = vmatprep.subr.bf16.mxu0 %v2414_v44 }
  0xa7   : > { %2189 = vmatmul.mubr.bf16.gmra.mxu0 %v1969_v34 }
  0xa8   : > { %2192 = vmatprep.mubr.bf16.mxu0 %v1970_v35  ;;  %1040 = vmatpush1.bf16.xpose.msra.mxu0 %v2412_v45 }
  0xa9   : > { %1041 = vmatprep.subr.bf16.mxu0 %v2417_v46 }
  0xaf   : > { %2193 = vmatmul.mubr.bf16.gmra.mxu0 %v1971_v36 }
  0xb0   : > { %1042 = vmatpush1.bf16.xpose.msra.mxu0 %v2415_v47 }
  0xb1   : > { %1043 = vmatprep.subr.bf16.mxu0 %v2420_v48 }
  0xb8   : > { %1044 = vmatpush1.bf16.xpose.msra.mxu0 %v2418_v49 }
 0x157   : > { %v2182_v50 = vpop.f32.mrf.mxu0 }
 0x158   : > { %v475_v56 = vadd.f32 %v2182_v50, %v1963_v51 }
 0x159   : > { %v466_v52 = vpop.f32.mrf.mxu0 }
 0x15a   : > { %v467_v53 = vadd.f32 %v1963_v51, %v466_v52 }
 0x15b   : > { %v2183_v54 = vpop.f32.mrf.mxu0 }
 0x15c   : > { %v478_v55 = vadd.f32 %v2183_v54, %v1963_v51  ;;  %2494 = vtanh.f32 %v467_v53 }
 0x15d   : > { %v469_v57 = vpop.f32.mrf.mxu0 }
 0x15e   : > { %v470_v58 = vadd.f32 %v1963_v51, %v469_v57  ;;  %2496 = vtanh.f32 %v478_v55 }
 0x15f   : > { %v2186_v59 = vpop.f32.mrf.mxu0 }
 0x160   : > { %2498 = vtanh.f32 %v470_v58  ;;  %v491_v60 = vadd.f32 %v2186_v59, %v1963_v51 }
 0x161   : > { %2500 = vtanh.f32 %v475_v56  ;;  %v482_v61 = vpop.f32.mrf.mxu0 }
 0x162   : > { %v483_v62 = vadd.f32 %v1963_v51, %v482_v61  ;;  %2502 = vtanh.f32 %v491_v60  ;;  %v2421_v60 = vld [vmem:[#allocation8 + $0x20] ss:$8 sps:$4 sm:$0xff]   ;;  %v2426_v61 = vld [vmem:[#allocation8 + $0x14] ss:$8 sps:$4 sm:$0xff]  }
 0x163   : > { %v2187_v63 = vpop.f32.mrf.mxu0 }
 0x164   : > { %v494_v0 = vadd.f32 %v2187_v63, %v1963_v51  ;;  %2504 = vtanh.f32 %v483_v62  ;;  %v2424_v62 = vld [vmem:[#allocation8 + $0x10] ss:$8 sps:$4 sm:$0xff]   ;;  %v2429_v63 = vld [vmem:[#allocation8 + $0x4] ss:$8 sps:$4 sm:$0xff]  }
 0x165   : > { %v485_v1 = vpop.f32.mrf.mxu0 }
 0x166   : > { %2506 = vtanh.f32 %v494_v0  ;;  %v486_v2 = vadd.f32 %v1963_v51, %v485_v1  ;;  %v2427_v0 = vld [vmem:[#allocation8] ss:$8 sps:$4 sm:$0xff]   ;;  %v2454_v1 = vld [vmem:[#allocation6 + $0xb8] sm:$0xff]  }
 0x167   : > { %v2190_v6 = vpop.f32.mrf.mxu0  ;;  %2228 = vmatprep.subr.bf16.mxu1 %v2454_v1 }
 0x168   : > { %2508 = vtanh.f32 %v486_v2  ;;  %v507_v20 = vadd.f32 %v2190_v6, %v1963_v51  ;;  %v2455_v2 = vld [vmem:[#allocation6 + $0xb0] sm:$0xff]   ;;  %v2456_v6 = vld [vmem:[#allocation6 + $0xa8] sm:$0xff]  }
 0x169   : > { %v498_v21 = vpop.f32.mrf.mxu0  ;;  %v2495_v23 = vpop.eup %2494 }
 0x16a   : > { %v499_v22 = vadd.f32 %v1963_v51, %v498_v21  ;;  %2510 = vtanh.f32 %v507_v20  ;;  %v2457_v20 = vld [vmem:[#allocation6 + $0xa0] sm:$0xff]   ;;  %v2458_v21 = vld [vmem:[#allocation6 + $0x98] sm:$0xff]  }
 0x16b   : > { %v2191_v24 = vpop.f32.mrf.mxu0  ;;  %v2497_v25 = vpop.eup %2496 }
 0x16c   : > { %v510_v26 = vadd.f32 %v2191_v24, %v1963_v51  ;;  %2512 = vtanh.f32 %v499_v22  ;;  %v283_v22 = vrot.slane %v2930_v5, 4  ;;  %v3011_v24 = vld [vmem:[%s3305_s3 + $0x1] ss:$0 sm:$0xff] }
 0x16d   : > { %v2499_v27 = vpop.eup %2498  ;;  %v501_v28 = vpop.f32.mrf.mxu0 }
 0x16e   : > { %v2501_v29 = vpop.eup %2500  ;;  %2514 = vtanh.f32 %v510_v26  ;;  %v502_v30 = vadd.f32 %v1963_v51, %v501_v28  ;;  %v545_v31 = vpack.c.bf16 %v2499_v27, %v2495_v23  ;;  %v281_v23 = vrot.slane %v2924_v3, 4 }
 0x16f   : > { %v546_v32 = vpack.c.bf16 %v2497_v25, %v2501_v29  ;;  %v2194_v33 = vpop.f32.mrf.mxu0  ;;  %v2503_v35 = vpop.eup %2502  ;;  %v315_v25 = vunpack.c.l.bf16 %v283_v22  ;;  %v284_v26 = vrot.slane %v2937_v7, 4  ;;  %v282_v27 = vrot.slane %v2927_v4, 4 }
 0x170   : > { %2516 = vtanh.f32 %v502_v30  ;;  %2212 = vmatprep.mubr.bf16.mxu1 %v545_v31  ;;  %v523_v34 = vadd.f32 %v2194_v33, %v1963_v51  ;;  %v313_v30 = vunpack.c.l.bf16 %v281_v23  ;;  %v287_v3 = vrot.slane %v2950_v10, 4 }
 0x171   : > { %2213 = vmatmul.mubr.bf16.vlgmr.msra.gmra.mxu1 %v546_v32  ;;  %v514_v36 = vpop.f32.mrf.mxu0  ;;  %v2505_v37 = vpop.eup %2504  ;;  %v316_v33 = vunpack.c.l.bf16 %v284_v26  ;;  %v285_v7 = vrot.slane %v2941_v8, 4  ;;  %v286_v10 = vrot.slane %v2944_v9, 4 }
 0x172   : > { %v515_v38 = vadd.f32 %v1963_v51, %v514_v36  ;;  %2518 = vtanh.f32 %v523_v34  ;;  %2229 = vmatpush3.bf16.xpose.msra.mxu1 %v2454_v1 }
 0x173   : > { %v2507_v39 = vpop.eup %2506  ;;  %v2195_v40 = vpop.f32.mrf.mxu0  ;;  %2230 = vmatprep.subr.bf16.mxu1 %v2455_v2 }
 0x174   : > { %v526_v41 = vadd.f32 %v2195_v40, %v1963_v51  ;;  %v548_v43 = vpack.c.bf16 %v2507_v39, %v2503_v35  ;;  %2520 = vtanh.f32 %v515_v38  ;;  %v314_v35 = vunpack.c.l.bf16 %v282_v27  ;;  %v2430_v27 = vld [vmem:[#allocation2] ss:$8 sps:$4 sm:$0xff]  }
 0x175   : > { %v2509_v42 = vpop.eup %2508  ;;  %v517_v44 = vpop.f32.mrf.mxu0  ;;  %v288_v39 = vrot.slane %v2953_v11, 4 }
 0x176   : > { %v547_v45 = vpack.c.bf16 %v2509_v42, %v2505_v37  ;;  %2522 = vtanh.f32 %v526_v41  ;;  %v518_v46 = vadd.f32 %v1963_v51, %v517_v44  ;;  %v2423_v51 = vld [vmem:[#allocation8 + $0x24] ss:$8 sps:$4 sm:$0xff]  }
 0x177   : > { %v2511_v47 = vpop.eup %2510  ;;  %1045 = vmatprep.subr.bf16.mxu0 %v2423_v51  ;;  %v320_v8 = vunpack.c.l.bf16 %v288_v39  ;;  %v292_v51 = vrot.slane %v2968_v15, 4  ;;  %v294_v39 = vrot.slane %v2977_v17, 4 }
 0x178   : > { %2216 = vmatprep.mubr.bf16.mxu1 %v547_v45  ;;  %2524 = vtanh.f32 %v518_v46  ;;  %1046 = vmatpush1.bf16.xpose.msra.mxu0 %v2421_v60 }
 0x179   : > { %2217 = vmatmul.mubr.bf16.gmra.mxu1 %v548_v43  ;;  %v2513_v48 = vpop.eup %2512  ;;  %1047 = vmatprep.subr.bf16.mxu0 %v2426_v61  ;;  %v319_v43 = vunpack.c.l.bf16 %v287_v3  ;;  %v296_v3 = vrot.slane %v2985_v19, 4 }
 0x17a   : > { %2231 = vmatpush3.bf16.xpose.msra.mxu1 %v2455_v2 }
 0x17b   : > { %v2515_v49 = vpop.eup %2514  ;;  %2232 = vmatprep.subr.bf16.mxu1 %v2456_v6 }
 0x17c   : > { %v550_v52 = vpack.c.bf16 %v2515_v49, %v2511_v47 }
 0x17d   : > { %v2517_v50 = vpop.eup %2516 }
 0x17e   : > { %v549_v53 = vpack.c.bf16 %v2517_v50, %v2513_v48  ;;  %v317_v48 = vunpack.c.l.bf16 %v285_v7 }
 0x17f   : > { %v2519_v54 = vpop.eup %2518 }
 0x180   : > { %2220 = vmatprep.mubr.bf16.mxu1 %v549_v53  ;;  %1048 = vmatpush1.bf16.xpose.msra.mxu0 %v2424_v62  ;;  %v291_v53 = vrot.slane %v2965_v14, 4  ;;  %v290_v14 = vrot.slane %v2961_v13, 4  ;;  %v293_v13 = vrot.slane %v2974_v16, 4 }
 0x181   : > { %2221 = vmatmul.mubr.bf16.gmra.mxu1 %v550_v52  ;;  %v2521_v55 = vpop.eup %2520  ;;  %1049 = vmatprep.subr.bf16.mxu0 %v2429_v63 }
 0x182   : > { %2233 = vmatpush3.bf16.xpose.msra.mxu1 %v2456_v6  ;;  %v323_v63 = vunpack.c.l.bf16 %v291_v53 }
 0x183   : > { %v2523_v56 = vpop.eup %2522  ;;  %2234 = vmatprep.subr.bf16.mxu1 %v2457_v20 }
 0x184   : > { %v552_v58 = vpack.c.bf16 %v2523_v56, %v2519_v54 }
 0x185   : > { %v2525_v57 = vpop.eup %2524 }
 0x186   : > { %v551_v59 = vpack.c.bf16 %v2525_v57, %v2521_v55  ;;  %v318_v55 = vunpack.c.l.bf16 %v286_v10  ;;  %v2435_v10 = vld [vmem:[#allocation2 + $0x10] ss:$8 sps:$4 sm:$0xff]  }
 0x188   : > { %2224 = vmatprep.mubr.bf16.mxu1 %v551_v59  ;;  %1050 = vmatpush1.bf16.xpose.msra.mxu0 %v2427_v0 }
 0x189   : > { %2225 = vmatmul.mubr.bf16.gmra.mxu1 %v552_v58  ;;  %v289_v58 = vrot.slane %v2956_v12, 4  ;;  %v324_v12 = vunpack.c.l.bf16 %v292_v51 }
 0x18a   : > { %2235 = vmatpush3.bf16.xpose.msra.mxu1 %v2457_v20 }
 0x18b   : > { %2236 = vmatprep.subr.bf16.mxu1 %v2458_v21  ;;  %v321_v20 = vunpack.c.l.bf16 %v289_v58  ;;  %v2444_v58 = vld [vmem:[#allocation2 + $0x40] ss:$8 sps:$4 sm:$0xff]  }
 0x192   : > { %2237 = vmatpush3.bf16.xpose.msra.mxu1 %v2458_v21 }
 0x231   : > { %v2214_v28 = vpop.f32.mrf.mxu1 }
 0x232   : > { %v669_v29 = vadd.f32 %v2214_v28, %v3011_v24 }
 0x233   : > { %v660_v31 = vpop.f32.mrf.mxu1 }
 0x234   : > { %v725_v32 = vadd.f32 %v669_v29, %v315_v25  ;;  %v661_v5 = vadd.f32 %v3011_v24, %v660_v31  ;;  %v295_v25 = vrot.slane %v2980_v18, 4 }
 0x235   : > { %v2215_v34 = vpop.f32.mrf.mxu1 }
 0x236   : > { %v2084_v36 = vpack.c.bf16 %v725_v32, %v725_v32  ;;  %v723_v37 = vadd.f32 %v661_v5, %v313_v30  ;;  %v672_v38 = vadd.f32 %v2215_v34, %v3011_v24  ;;  %v322_v32 = vunpack.c.l.bf16 %v290_v14  ;;  %v2461_v14 = vld [vmem:[#allocation6 + $0x80] sm:$0xff]  }
 0x237   : > { %v663_v4 = vpop.f32.mrf.mxu1 }
 0x238   : > { %821 = vst [vmem:[#allocation2 + $0x14] sm:$0xf] %v2084_v36  ;;  %v2082_v40 = vpack.c.bf16 %v723_v37, %v723_v37  ;;  %v726_v41 = vadd.f32 %v672_v38, %v316_v33  ;;  %v664_v42 = vadd.f32 %v3011_v24, %v663_v4  ;;  %v327_v36 = vunpack.c.l.bf16 %v295_v25 }
 0x239   : > { %v2218_v44 = vpop.f32.mrf.mxu1  ;;  %v325_v37 = vunpack.c.l.bf16 %v293_v13 }
 0x23a   : > { %819 = vst [vmem:[#allocation2 + $0x4] sm:$0xf] %v2082_v40  ;;  %v2085_v45 = vpack.c.bf16 %v726_v41, %v726_v41  ;;  %v724_v46 = vadd.f32 %v664_v42, %v314_v35  ;;  %v685_v47 = vadd.f32 %v2218_v44, %v3011_v24 }
 0x23b   : > { %v676_v49 = vpop.f32.mrf.mxu1 }
 0x23c   : > { %822 = vst [vmem:[#allocation2 + $0x1c] sm:$0xf] %v2085_v45  ;;  %v2083_v50 = vpack.c.bf16 %v724_v46, %v724_v46  ;;  %v729_v11 = vadd.f32 %v685_v47, %v319_v43  ;;  %v677_v52 = vadd.f32 %v3011_v24, %v676_v49  ;;  %v328_v43 = vunpack.c.l.bf16 %v296_v3 }
 0x23d   : > { %v2219_v54 = vpop.f32.mrf.mxu1 }
 0x23e   : > { %820 = vst [vmem:[#allocation2 + $0xc] sm:$0xf] %v2083_v50  ;;  %v2088_v56 = vpack.c.bf16 %v729_v11, %v729_v11  ;;  %v727_v9 = vadd.f32 %v677_v52, %v317_v48  ;;  %v688_v57 = vadd.f32 %v2219_v54, %v3011_v24  ;;  %v326_v48 = vunpack.c.l.bf16 %v294_v39 }
 0x23f   : > { %v679_v59 = vpop.f32.mrf.mxu1 }
 0x240   : > { %825 = vst [vmem:[#allocation2 + $0x34] sm:$0xf] %v2088_v56  ;;  %v2086_v60 = vpack.c.bf16 %v727_v9, %v727_v9  ;;  %v730_v61 = vadd.f32 %v688_v57, %v320_v8  ;;  %v680_v62 = vadd.f32 %v3011_v24, %v679_v59  ;;  %v2441_v9 = vld [vmem:[#allocation2 + $0x30] ss:$8 sps:$4 sm:$0xff]  }
 0x241   : > { %v2222_v0 = vpop.f32.mrf.mxu1 }
 0x242   : > { %823 = vst [vmem:[#allocation2 + $0x24] sm:$0xf] %v2086_v60  ;;  %v2089_v1 = vpack.c.bf16 %v730_v61, %v730_v61  ;;  %v728_v2 = vadd.f32 %v680_v62, %v318_v55  ;;  %v701_v6 = vadd.f32 %v2222_v0, %v3011_v24  ;;  %v2438_v55 = vld [vmem:[#allocation2 + $0x20] ss:$8 sps:$4 sm:$0xff]   ;;  %v2453_v62 = vld [vmem:[#allocation2 + $0x70] ss:$8 sps:$4 sm:$0xff]  }
 0x243   : > { %v692_v21 = vpop.f32.mrf.mxu1  ;;  %v2433_v33 = vld [vmem:[#allocation2 + $0x14] ss:$8 sps:$4 sm:$0xff]   ;;  %v2450_v60 = vld [vmem:[#allocation2 + $0x60] ss:$8 sps:$4 sm:$0xff]  }
 0x244   : > { %826 = vst [vmem:[#allocation2 + $0x3c] sm:$0xf] %v2089_v1  ;;  %v2087_v22 = vpack.c.bf16 %v728_v2, %v728_v2  ;;  %v733_v15 = vadd.f32 %v701_v6, %v323_v63  ;;  %v693_v23 = vadd.f32 %v3011_v24, %v692_v21  ;;  %v2459_v63 = vld [vmem:[#allocation6 + $0x90] sm:$0xff]   ;;  %v2460_v0 = vld [vmem:[#allocation6 + $0x88] sm:$0xff]   ;;  %v2462_v1 = vld [vmem:[#allocation6 + $0xf8] sm:$0xff]  }
 0x245   : > { %v2223_v26 = vpop.f32.mrf.mxu1  ;;  %v2432_v28 = vld [vmem:[#allocation2 + $0x4] ss:$8 sps:$4 sm:$0xff]   ;;  %2238 = vmatprep.subr.bf16.mxu1 %v2459_v63  ;;  %v3046_v2 = vld [vmem:[%s3305_s3 + $0x2] ss:$0 sm:$0xff] }
 0x246   : > { %824 = vst [vmem:[#allocation2 + $0x2c] sm:$0xf] %v2087_v22  ;;  %v2092_v29 = vpack.c.bf16 %v733_v15, %v733_v15  ;;  %v731_v30 = vadd.f32 %v693_v23, %v321_v20  ;;  %v704_v31 = vadd.f32 %v2223_v26, %v3011_v24  ;;  %1067 = vmatprep.mubr.bf16.mxu0 %v2432_v28 }
 0x247   : > { %v695_v5 = vpop.f32.mrf.mxu1  ;;  %1068 = vmatmul.mubr.bf16.vlgmr.msra.gmra.mxu0 %v2430_v27  ;;  %2239 = vmatpush3.bf16.xpose.msra.mxu1 %v2459_v63 }
 0x248   : > { %829 = vst [vmem:[#allocation2 + $0x54] sm:$0xf] %v2092_v29  ;;  %v2090_v34 = vpack.c.bf16 %v731_v30, %v731_v30  ;;  %v734_v35 = vadd.f32 %v704_v31, %v324_v12  ;;  %v696_v18 = vadd.f32 %v3011_v24, %v695_v5  ;;  %1075 = vmatprep.mubr.bf16.mxu0 %v2433_v33 }
 0x249   : > { %v2226_v16 = vpop.f32.mrf.mxu1  ;;  %2240 = vmatprep.subr.bf16.mxu1 %v2460_v0 }
 0x24a   : > { %827 = vst [vmem:[#allocation2 + $0x44] sm:$0xf] %v2090_v34  ;;  %v2093_v38 = vpack.c.bf16 %v734_v35, %v734_v35  ;;  %v732_v7 = vadd.f32 %v696_v18, %v322_v32  ;;  %v717_v4 = vadd.f32 %v2226_v16, %v3011_v24 }
 0x24b   : > { %v708_v40 = vpop.f32.mrf.mxu1  ;;  %v2439_v56 = vld [vmem:[#allocation2 + $0x34] ss:$8 sps:$4 sm:$0xff]  }
 0x24c   : > { %830 = vst [vmem:[#allocation2 + $0x5c] sm:$0xf] %v2093_v38  ;;  %v2091_v19 = vpack.c.bf16 %v732_v7, %v732_v7  ;;  %v737_v41 = vadd.f32 %v717_v4, %v327_v36  ;;  %v709_v42 = vadd.f32 %v3011_v24, %v708_v40 }
 0x24d   : > { %v2227_v44 = vpop.f32.mrf.mxu1  ;;  %v2436_v49 = vld [vmem:[#allocation2 + $0x24] ss:$8 sps:$4 sm:$0xff]  }
 0x24e   : > { %828 = vst [vmem:[#allocation2 + $0x4c] sm:$0xf] %v2091_v19  ;;  %v2096_v45 = vpack.c.bf16 %v737_v41, %v737_v41  ;;  %v735_v46 = vadd.f32 %v709_v42, %v325_v37  ;;  %v720_v47 = vadd.f32 %v2227_v44, %v3011_v24 }
 0x24f   : > { %v711_v8 = vpop.f32.mrf.mxu1  ;;  %1076 = vmatmul.mubr.bf16.gmra.mxu0 %v2435_v10  ;;  %2241 = vmatpush3.bf16.xpose.msra.mxu1 %v2460_v0 }
 0x250   : > { %833 = vst [vmem:[#allocation2 + $0x74] sm:$0xf] %v2096_v45  ;;  %v2094_v17 = vpack.c.bf16 %v735_v46, %v735_v46  ;;  %v738_v50 = vadd.f32 %v720_v47, %v328_v43  ;;  %v712_v11 = vadd.f32 %v3011_v24, %v711_v8  ;;  %1083 = vmatprep.mubr.bf16.mxu0 %v2436_v49  ;;  %v2447_v24 = vld [vmem:[#allocation2 + $0x50] ss:$8 sps:$4 sm:$0xff]  }
 0x251   : > { %2242 = vmatprep.subr.bf16.mxu1 %v2461_v14 }
 0x252   : > { %831 = vst [vmem:[#allocation2 + $0x64] sm:$0xf] %v2094_v17  ;;  %v2097_v52 = vpack.c.bf16 %v738_v50, %v738_v50  ;;  %v736_v53 = vadd.f32 %v712_v11, %v326_v48 }
 0x253   : > { %v2445_v59 = vld [vmem:[#allocation2 + $0x54] ss:$8 sps:$4 sm:$0xff]  }
 0x254   : > { %834 = vst [vmem:[#allocation2 + $0x7c] sm:$0xf] %v2097_v52  ;;  %v2095_v54 = vpack.c.bf16 %v736_v53, %v736_v53 }
 0x255   : > { %v2442_v57 = vld [vmem:[#allocation2 + $0x44] ss:$8 sps:$4 sm:$0xff]  }
 0x256   : > { %832 = vst [vmem:[#allocation2 + $0x6c] sm:$0xf] %v2095_v54 }
 0x257   : > { %1084 = vmatmul.mubr.bf16.gmra.mxu0 %v2438_v55  ;;  %2243 = vmatpush3.bf16.xpose.msra.mxu1 %v2461_v14 }
 0x258   : > { %1091 = vmatprep.mubr.bf16.mxu0 %v2439_v56  ;;  %2260 = vmatprep.subr.bf16.mxu1 %v2462_v1 }
 0x25b   : > { %v2451_v61 = vld [vmem:[#allocation2 + $0x74] ss:$8 sps:$4 sm:$0xff]  }
 0x25d   : > { %v2448_v51 = vld [vmem:[#allocation2 + $0x64] ss:$8 sps:$4 sm:$0xff]  }
 0x25f   : > { %1092 = vmatmul.mubr.bf16.gmra.mxu0 %v2441_v9 }
 0x260   : > { %1099 = vmatprep.mubr.bf16.mxu0 %v2442_v57 }
 0x267   : > { %1100 = vmatmul.mubr.bf16.gmra.mxu0 %v2444_v58 }
 0x268   : > { %1107 = vmatprep.mubr.bf16.mxu0 %v2445_v59 }
 0x26f   : > { %1108 = vmatmul.mubr.bf16.gmra.mxu0 %v2447_v24 }
 0x270   : > { %1115 = vmatprep.mubr.bf16.mxu0 %v2448_v51 }
 0x277   : > { %1116 = vmatmul.mubr.bf16.gmra.mxu0 %v2450_v60 }
 0x278   : > { %1123 = vmatprep.mubr.bf16.mxu0 %v2451_v61 }
 0x27f   : > { %1124 = vmatmul.mubr.bf16.gmra.mxu0 %v2453_v62 }
 0x307   : > { %v1069_v6 = vpop.f32.mrf.mxu0 }
 0x308   : > { %v1070_v20 = vadd.f32 %v3046_v2, %v1069_v6 }
 0x309   : > { %v1071_v21 = vpop.f32.mrf.mxu0 }
 0x30a   : > { %2526 = vtanh.f32 %v1070_v20 }
 0x30b   : > { %v1072_v12 = vpop.f32.mrf.mxu0 }
 0x30c   : > { %v1073_v22 = vadd.f32 %v3046_v2, %v1072_v12 }
 0x30d   : > { %v1074_v15 = vpop.f32.mrf.mxu0 }
 0x30e   : > { %2528 = vtanh.f32 %v1073_v22 }
 0x30f   : > { %v1077_v23 = vpop.f32.mrf.mxu0 }
 0x310   : > { %v1078_v25 = vadd.f32 %v3046_v2, %v1077_v23 }
 0x311   : > { %v1079_v26 = vpop.f32.mrf.mxu0 }
 0x312   : > { %2530 = vtanh.f32 %v1078_v25  ;;  %v2463_v26 = vld [vmem:[#allocation6 + $0xf0] sm:$0xff]  }
 0x313   : > { %v1080_v27 = vpop.f32.mrf.mxu0 }
 0x314   : > { %v1081_v28 = vadd.f32 %v3046_v2, %v1080_v27  ;;  %v2464_v27 = vld [vmem:[#allocation6 + $0xe8] sm:$0xff]  }
 0x315   : > { %v1082_v13 = vpop.f32.mrf.mxu0 }
 0x316   : > { %2532 = vtanh.f32 %v1081_v28  ;;  %v2465_v28 = vld [vmem:[#allocation6 + $0xe0] sm:$0xff]   ;;  %v2466_v13 = vld [vmem:[#allocation6 + $0xd8] sm:$0xff]  }
 0x317   : > { %v1085_v29 = vpop.f32.mrf.mxu0  ;;  %v3053_v32 = vpop.eup %2526 }
 0x318   : > { %v1086_v30 = vadd.f32 %v3046_v2, %v1085_v29  ;;  %v2467_v29 = vld [vmem:[#allocation6 + $0xd0] sm:$0xff]  }
 0x319   : > { %v1087_v31 = vpop.f32.mrf.mxu0 }
 0x31a   : > { %2534 = vtanh.f32 %v1086_v30  ;;  %v2468_v30 = vld [vmem:[#allocation6 + $0xc8] sm:$0xff]   ;;  %v2469_v31 = vld [vmem:[#allocation6 + $0xc0] sm:$0xff]  }
 0x31b   : > { %v3055_v5 = vpop.eup %2528  ;;  %v1088_v33 = vpop.f32.mrf.mxu0 }
 0x31c   : > { %v1089_v3 = vadd.f32 %v3046_v2, %v1088_v33  ;;  %v1148_v34 = vpack.c.bf16 %v3055_v5, %v3053_v32  ;;  %v3112_v33 = vld [vmem:[#allocation8 + $0xf0] ss:$8 sps:$4 sm:$0xff]  }
 0x31d   : > { %v1090_v35 = vpop.f32.mrf.mxu0 }
 0x31e   : > { %2536 = vtanh.f32 %v1089_v3  ;;  %2244 = vmatprep.mubr.bf16.mxu1 %v1148_v34  ;;  %v2472_v3 = vld [vmem:[#allocation8 + $0xf4] ss:$8 sps:$4 sm:$0xff]   ;;  %v3114_v34 = vld [vmem:[#allocation8 + $0xe4] ss:$8 sps:$4 sm:$0xff]   ;;  %v3117_v35 = vld [vmem:[#allocation8 + $0xe0] ss:$8 sps:$4 sm:$0xff]  }
 0x31f   : > { %v1093_v18 = vpop.f32.mrf.mxu0  ;;  %v3061_v37 = vpop.eup %2530  ;;  %1697 = vmatprep.subr.bf16.mxu0 %v2472_v3 }
 0x320   : > { %v1094_v36 = vadd.f32 %v3046_v2, %v1093_v18  ;;  %1698 = vmatpush1.bf16.msra.mxu0 %v3112_v33  ;;  %v3120_v18 = vld [vmem:[#allocation8 + $0xd4] ss:$8 sps:$4 sm:$0xff]  }
 0x321   : > { %v1095_v16 = vpop.f32.mrf.mxu0  ;;  %1699 = vmatprep.subr.bf16.mxu0 %v3114_v34 }
 0x322   : > { %2538 = vtanh.f32 %v1094_v36  ;;  %v3123_v36 = vld [vmem:[#allocation8 + $0xd0] ss:$8 sps:$4 sm:$0xff]   ;;  %v3126_v16 = vld [vmem:[#allocation8 + $0xc4] ss:$8 sps:$4 sm:$0xff]  }
 0x323   : > { %v3063_v38 = vpop.eup %2532  ;;  %v1096_v7 = vpop.f32.mrf.mxu0 }
 0x324   : > { %v1097_v4 = vadd.f32 %v3046_v2, %v1096_v7  ;;  %v1149_v39 = vpack.c.bf16 %v3063_v38, %v3061_v37  ;;  %1700 = vmatpush1.bf16.msra.mxu0 %v3117_v35  ;;  %v3129_v7 = vld [vmem:[#allocation8 + $0xc0] ss:$8 sps:$4 sm:$0xff]  }
 0x325   : > { %v1098_v40 = vpop.f32.mrf.mxu0  ;;  %1701 = vmatprep.subr.bf16.mxu0 %v3120_v18 }
 0x326   : > { %2540 = vtanh.f32 %v1097_v4  ;;  %2245 = vmatmul.mubr.bf16.vlgmr.msra.gmra.mxu1 %v1149_v39  ;;  %v3132_v4 = vld [vmem:[#allocation8 + $0xb4] ss:$8 sps:$4 sm:$0xff]   ;;  %v3135_v39 = vld [vmem:[#allocation8 + $0xb0] ss:$8 sps:$4 sm:$0xff]   ;;  %v3138_v40 = vld [vmem:[#allocation8 + $0xa4] ss:$8 sps:$4 sm:$0xff]  }
 0x327   : > { %v1101_v19 = vpop.f32.mrf.mxu0  ;;  %2261 = vmatpush3.bf16.msra.mxu1 %v2462_v1  ;;  %v3069_v43 = vpop.eup %2534 }
 0x328   : > { %v1102_v41 = vadd.f32 %v3046_v2, %v1101_v19  ;;  %2262 = vmatprep.subr.bf16.mxu1 %v2463_v26  ;;  %1702 = vmatpush1.bf16.msra.mxu0 %v3123_v36  ;;  %v3141_v19 = vld [vmem:[#allocation8 + $0xa0] ss:$8 sps:$4 sm:$0xff]  }
 0x329   : > { %v1103_v42 = vpop.f32.mrf.mxu0  ;;  %1703 = vmatprep.subr.bf16.mxu0 %v3126_v16 }
 0x32a   : > { %2542 = vtanh.f32 %v1102_v41  ;;  %v3148_v41 = vld [vmem:[%s3305_s3 + $0x3] ss:$0 sm:$0xff] }
 0x32b   : > { %v3071_v44 = vpop.eup %2536  ;;  %v1104_v10 = vpop.f32.mrf.mxu0  ;;  %2263 = vmatpush3.bf16.msra.mxu1 %v2463_v26 }
 0x32c   : > { %v1105_v45 = vadd.f32 %v3046_v2, %v1104_v10  ;;  %v1150_v46 = vpack.c.bf16 %v3071_v44, %v3069_v43  ;;  %2264 = vmatprep.subr.bf16.mxu1 %v2464_v27  ;;  %1704 = vmatpush1.bf16.msra.mxu0 %v3129_v7 }
 0x32d   : > { %v1106_v47 = vpop.f32.mrf.mxu0  ;;  %1705 = vmatprep.subr.bf16.mxu0 %v3132_v4 }
 0x32e   : > { %2544 = vtanh.f32 %v1105_v45  ;;  %2248 = vmatprep.mubr.bf16.mxu1 %v1150_v46 }
 0x32f   : > { %v1109_v48 = vpop.f32.mrf.mxu0  ;;  %v3077_v17 = vpop.eup %2538  ;;  %2265 = vmatpush3.bf16.msra.mxu1 %v2464_v27 }
 0x330   : > { %v1110_v49 = vadd.f32 %v3046_v2, %v1109_v48  ;;  %2266 = vmatprep.subr.bf16.mxu1 %v2465_v28  ;;  %1706 = vmatpush1.bf16.msra.mxu0 %v3135_v39 }
 0x331   : > { %v1111_v8 = vpop.f32.mrf.mxu0  ;;  %1707 = vmatprep.subr.bf16.mxu0 %v3138_v40 }
 0x332   : > { %2546 = vtanh.f32 %v1110_v49 }
 0x333   : > { %v3079_v50 = vpop.eup %2540  ;;  %v1112_v11 = vpop.f32.mrf.mxu0  ;;  %2267 = vmatpush3.bf16.msra.mxu1 %v2465_v28 }
 0x334   : > { %v1113_v52 = vadd.f32 %v3046_v2, %v1112_v11  ;;  %v1151_v53 = vpack.c.bf16 %v3079_v50, %v3077_v17  ;;  %2268 = vmatprep.subr.bf16.mxu1 %v2466_v13  ;;  %1708 = vmatpush1.bf16.msra.mxu0 %v3141_v19 }
 0x335   : > { %v1114_v54 = vpop.f32.mrf.mxu0 }
 0x336   : > { %2548 = vtanh.f32 %v1113_v52  ;;  %2249 = vmatmul.mubr.bf16.gmra.mxu1 %v1151_v53 }
 0x337   : > { %v1117_v55 = vpop.f32.mrf.mxu0  ;;  %v3085_v57 = vpop.eup %2542  ;;  %2269 = vmatpush3.bf16.msra.mxu1 %v2466_v13 }
 0x338   : > { %v1118_v56 = vadd.f32 %v3046_v2, %v1117_v55  ;;  %2270 = vmatprep.subr.bf16.mxu1 %v2467_v29 }
 0x339   : > { %v1119_v9 = vpop.f32.mrf.mxu0 }
 0x33a   : > { %2550 = vtanh.f32 %v1118_v56 }
 0x33b   : > { %v3087_v58 = vpop.eup %2544  ;;  %v1120_v59 = vpop.f32.mrf.mxu0  ;;  %2271 = vmatpush3.bf16.msra.mxu1 %v2467_v29 }
 0x33c   : > { %v1121_v24 = vadd.f32 %v3046_v2, %v1120_v59  ;;  %v1152_v51 = vpack.c.bf16 %v3087_v58, %v3085_v57  ;;  %2272 = vmatprep.subr.bf16.mxu1 %v2468_v30 }
 0x33d   : > { %v1122_v60 = vpop.f32.mrf.mxu0 }
 0x33e   : > { %2552 = vtanh.f32 %v1121_v24  ;;  %2252 = vmatprep.mubr.bf16.mxu1 %v1152_v51 }
 0x33f   : > { %v1125_v61 = vpop.f32.mrf.mxu0  ;;  %v3093_v0 = vpop.eup %2546  ;;  %2273 = vmatpush3.bf16.msra.mxu1 %v2468_v30 }
 0x340   : > { %v1126_v62 = vadd.f32 %v3046_v2, %v1125_v61  ;;  %2274 = vmatprep.subr.bf16.mxu1 %v2469_v31 }
 0x341   : > { %v1127_v63 = vpop.f32.mrf.mxu0 }
 0x342   : > { %2554 = vtanh.f32 %v1126_v62 }
 0x343   : > { %v3095_v14 = vpop.eup %2548  ;;  %v1128_v1 = vpop.f32.mrf.mxu0  ;;  %2275 = vmatpush3.bf16.msra.mxu1 %v2469_v31 }
 0x344   : > { %v1129_v6 = vadd.f32 %v3046_v2, %v1128_v1  ;;  %v1153_v20 = vpack.c.bf16 %v3095_v14, %v3093_v0  ;;  %2292 = vmatprep.subr.bf16.mxu1 %v2472_v3 }
 0x345   : > { %v1130_v21 = vpop.f32.mrf.mxu0 }
 0x346   : > { %2556 = vtanh.f32 %v1129_v6  ;;  %2253 = vmatmul.mubr.bf16.gmra.mxu1 %v1153_v20 }
 0x347   : > { %v3100_v12 = vpop.eup %2550 }
 0x34b   : > { %v3102_v22 = vpop.eup %2552 }
 0x34c   : > { %v1154_v15 = vpack.c.bf16 %v3102_v22, %v3100_v12 }
 0x34e   : > { %2256 = vmatprep.mubr.bf16.mxu1 %v1154_v15 }
 0x34f   : > { %v3106_v23 = vpop.eup %2554 }
 0x353   : > { %v3108_v25 = vpop.eup %2556 }
 0x354   : > { %v1155_v2 = vpack.c.bf16 %v3108_v25, %v3106_v23 }
 0x356   : > { %2257 = vmatmul.mubr.bf16.gmra.mxu1 %v1155_v2 }
 0x3e6   : > { %v2246_v42 = vpop.f32.mrf.mxu1 }
 0x3e7   : > { %v1272_v10 = vadd.f32 %v2246_v42, %v3148_v41 }
 0x3e8   : > { %v1263_v45 = vpop.f32.mrf.mxu1 }
 0x3e9   : > { %v1264_v46 = vadd.f32 %v3148_v41, %v1263_v45 }
 0x3ea   : > { %v2247_v47 = vpop.f32.mrf.mxu1 }
 0x3eb   : > { %2558 = vtanh.f32 %v1264_v46  ;;  %v1275_v48 = vadd.f32 %v2247_v47, %v3148_v41 }
 0x3ec   : > { %2560 = vtanh.f32 %v1272_v10  ;;  %v1266_v49 = vpop.f32.mrf.mxu1 }
 0x3ed   : > { %2562 = vtanh.f32 %v1275_v48  ;;  %v1267_v8 = vadd.f32 %v3148_v41, %v1266_v49 }
 0x3ef   : > { %2564 = vtanh.f32 %v1267_v8 }
 0x3f6   : > { %v2250_v11 = vpop.f32.mrf.mxu1 }
 0x3f7   : > { %v1288_v53 = vadd.f32 %v2250_v11, %v3148_v41 }
 0x3f8   : > { %v2559_v52 = vpop.eup %2558  ;;  %v1279_v54 = vpop.f32.mrf.mxu1 }
 0x3f9   : > { %v2561_v55 = vpop.eup %2560  ;;  %v1280_v56 = vadd.f32 %v3148_v41, %v1279_v54  ;;  %v1342_v24 = vmul.f32 %v2559_v52, %v2559_v52 }
 0x3fa   : > { %v2563_v9 = vpop.eup %2562  ;;  %v2251_v59 = vpop.f32.mrf.mxu1  ;;  %v1344_v62 = vmul.f32 %v2561_v55, %v2561_v55 }
 0x3fb   : > { %v1345_v51 = vmul.f32 %v2563_v9, %v2563_v9  ;;  %2566 = vtanh.f32 %v1280_v56  ;;  %v1291_v60 = vadd.f32 %v2251_v59, %v3148_v41  ;;  %v1358_v21 = vsub.f32 1.0, %v1342_v24 }
 0x3fc   : > { %v2565_v61 = vpop.eup %2564  ;;  %2568 = vtanh.f32 %v1288_v53  ;;  %v1282_v63 = vpop.f32.mrf.mxu1  ;;  %v1360_v2 = vsub.f32 1.0, %v1344_v62 }
 0x3fd   : > { %v1343_v1 = vmul.f32 %v2565_v61, %v2565_v61  ;;  %2570 = vtanh.f32 %v1291_v60  ;;  %v1283_v6 = vadd.f32 %v3148_v41, %v1282_v63  ;;  %v1361_v20 = vsub.f32 1.0, %v1345_v51 }
 0x3ff   : > { %v1359_v15 = vsub.f32 1.0, %v1343_v1  ;;  %2572 = vtanh.f32 %v1283_v6  ;;  %v1375_v27 = vpack.c.bf16 %v1361_v20, %v1360_v2 }
 0x401   : > { %v1374_v26 = vpack.c.bf16 %v1359_v15, %v1358_v21 }
 0x403   : > { %2276 = vmatprep.mubr.bf16.mxu1 %v1374_v26 }
 0x404   : > { %2277 = vmatmul.mubr.bf16.vlgmr.msra.gmra.mxu1 %v1375_v27 }
 0x405   : > { %2300 = vmatpush1.bf16.msra.mxu1 %v3112_v33 }
 0x406   : > { %v2254_v28 = vpop.f32.mrf.mxu1  ;;  %2293 = vmatprep.subr.bf16.mxu1 %v3114_v34 }
 0x407   : > { %v1304_v29 = vadd.f32 %v2254_v28, %v3148_v41 }
 0x408   : > { %v2567_v13 = vpop.eup %2566  ;;  %v1295_v30 = vpop.f32.mrf.mxu1 }
 0x409   : > { %v2569_v31 = vpop.eup %2568  ;;  %v1296_v3 = vadd.f32 %v3148_v41, %v1295_v30  ;;  %2301 = vmatpush1.bf16.msra.mxu1 %v3117_v35  ;;  %v1346_v45 = vmul.f32 %v2567_v13, %v2567_v13 }
 0x40a   : > { %v2571_v42 = vpop.eup %2570  ;;  %v2255_v10 = vpop.f32.mrf.mxu1  ;;  %2294 = vmatprep.subr.bf16.mxu1 %v3120_v18  ;;  %v1348_v34 = vmul.f32 %v2569_v31, %v2569_v31 }
 0x40b   : > { %v1349_v46 = vmul.f32 %v2571_v42, %v2571_v42  ;;  %2574 = vtanh.f32 %v1296_v3  ;;  %v1307_v33 = vadd.f32 %v2255_v10, %v3148_v41  ;;  %v1362_v11 = vsub.f32 1.0, %v1346_v45 }
 0x40c   : > { %v2573_v47 = vpop.eup %2572  ;;  %2576 = vtanh.f32 %v1304_v29  ;;  %v1298_v48 = vpop.f32.mrf.mxu1  ;;  %v1364_v52 = vsub.f32 1.0, %v1348_v34  ;;  %v2493_v34 = vld [vmem:[#allocation8 + $0x84] ss:$8 sps:$4 sm:$0xff]  }
 0x40d   : > { %v1347_v49 = vmul.f32 %v2573_v47, %v2573_v47  ;;  %2578 = vtanh.f32 %v1307_v33  ;;  %v1299_v8 = vadd.f32 %v3148_v41, %v1298_v48  ;;  %2302 = vmatpush1.bf16.msra.mxu1 %v3123_v36  ;;  %v1365_v35 = vsub.f32 1.0, %v1349_v46  ;;  %v2490_v33 = vld [vmem:[#allocation8 + $0x94] ss:$8 sps:$4 sm:$0xff]   ;;  %v2488_v47 = vld [vmem:[#allocation8 + $0x90] ss:$8 sps:$4 sm:$0xff]  }
 0x40e   : > { %2295 = vmatprep.subr.bf16.mxu1 %v3126_v16  ;;  %1709 = vmatprep.subr.bf16.mxu0 %v2490_v33  ;;  %v2491_v48 = vld [vmem:[#allocation8 + $0x80] ss:$8 sps:$4 sm:$0xff]  }
 0x40f   : > { %v1363_v18 = vsub.f32 1.0, %v1347_v49  ;;  %2580 = vtanh.f32 %v1299_v8  ;;  %v1377_v54 = vpack.c.bf16 %v1365_v35, %v1364_v52  ;;  %1710 = vmatpush1.bf16.msra.mxu0 %v2488_v47  ;;  %v2747_v49 = vmov 0  }
 0x410   : > { %1711 = vmatprep.subr.bf16.mxu0 %v2493_v34  ;;  %1729 = vmatprep.mubr.bf16.mxu0 %v2747_v49  ;;  %v1546_v8 = vmul.f32 %v3061_v37, %v3061_v37  ;;  %v1547_v35 = vmul.f32 %v3063_v38, %v3063_v38  ;;  %v1545_v52 = vmul.f32 %v3055_v5, %v3055_v5 }
 0x411   : > { %v1376_v53 = vpack.c.bf16 %v1363_v18, %v1362_v11  ;;  %2303 = vmatpush1.bf16.msra.mxu1 %v3129_v7  ;;  %v1544_v18 = vmul.f32 %v3053_v32, %v3053_v32  ;;  %v1550_v32 = vmul.f32 %v3077_v17, %v3077_v17  ;;  %v1551_v5 = vmul.f32 %v3079_v50, %v3079_v50 }
 0x412   : > { %2296 = vmatprep.subr.bf16.mxu1 %v3132_v4 }
 0x413   : > { %2280 = vmatprep.mubr.bf16.mxu1 %v1376_v53  ;;  %1712 = vmatpush1.bf16.msra.mxu0 %v2491_v48 }
 0x414   : > { %2281 = vmatmul.mubr.bf16.gmra.mxu1 %v1377_v54  ;;  %v1562_v54 = vsub.f32 1.0, %v1546_v8 }
 0x415   : > { %2304 = vmatpush1.bf16.msra.mxu1 %v3135_v39 }
 0x416   : > { %v2258_v55 = vpop.f32.mrf.mxu1  ;;  %2297 = vmatprep.subr.bf16.mxu1 %v3138_v40 }
 0x417   : > { %v1320_v16 = vadd.f32 %v2258_v55, %v3148_v41  ;;  %v1563_v55 = vsub.f32 1.0, %v1547_v35 }
 0x418   : > { %v2575_v36 = vpop.eup %2574  ;;  %v1311_v56 = vpop.f32.mrf.mxu1 }
 0x419   : > { %v2577_v9 = vpop.eup %2576  ;;  %v1312_v59 = vadd.f32 %v3148_v41, %v1311_v56  ;;  %2305 = vmatpush1.bf16.msra.mxu1 %v3141_v19  ;;  %v1350_v51 = vmul.f32 %v2575_v36, %v2575_v36  ;;  %v1560_v56 = vsub.f32 1.0, %v1544_v18 }
 0x41a   : > { %v2579_v7 = vpop.eup %2578  ;;  %v2259_v24 = vpop.f32.mrf.mxu1  ;;  %v1352_v61 = vmul.f32 %v2577_v9, %v2577_v9  ;;  %2298 = vmatprep.subr.bf16.mxu1 %v2490_v33 }
 0x41b   : > { %v1353_v4 = vmul.f32 %v2579_v7, %v2579_v7  ;;  %2582 = vtanh.f32 %v1312_v59  ;;  %v1323_v60 = vadd.f32 %v2259_v24, %v3148_v41  ;;  %v1366_v6 = vsub.f32 1.0, %v1350_v51 }
 0x41c   : > { %v2581_v39 = vpop.eup %2580  ;;  %2584 = vtanh.f32 %v1320_v16  ;;  %v1314_v40 = vpop.f32.mrf.mxu1  ;;  %v1368_v19 = vsub.f32 1.0, %v1352_v61  ;;  %v1561_v59 = vsub.f32 1.0, %v1545_v52 }
 0x41d   : > { %v1351_v62 = vmul.f32 %v2581_v39, %v2581_v39  ;;  %2586 = vtanh.f32 %v1323_v60  ;;  %v1315_v63 = vadd.f32 %v3148_v41, %v1314_v40  ;;  %v1369_v1 = vsub.f32 1.0, %v1353_v4  ;;  %2306 = vmatpush1.bf16.msra.mxu1 %v2488_v47 }
 0x41e   : > { %2299 = vmatprep.subr.bf16.mxu1 %v2493_v34  ;;  %v1548_v60 = vmul.f32 %v3069_v43, %v3069_v43  ;;  %v1549_v39 = vmul.f32 %v3071_v44, %v3071_v44  ;;  %v1566_v40 = vsub.f32 1.0, %v1550_v32  ;;  %v1554_v43 = vmul.f32 %v3093_v0, %v3093_v0 }
 0x41f   : > { %v1367_v20 = vsub.f32 1.0, %v1351_v62  ;;  %2588 = vtanh.f32 %v1315_v63  ;;  %v1379_v15 = vpack.c.bf16 %v1369_v1, %v1368_v19  ;;  %v1567_v62 = vsub.f32 1.0, %v1551_v5 }
 0x420   : > { %v1555_v44 = vmul.f32 %v3095_v14, %v3095_v14  ;;  %v1556_v34 = vmul.f32 %v3100_v12, %v3100_v12 }
 0x421   : > { %v1378_v21 = vpack.c.bf16 %v1367_v20, %v1366_v6  ;;  %2307 = vmatpush1.bf16.msra.mxu1 %v2491_v48  ;;  %v1564_v6 = vsub.f32 1.0, %v1548_v60  ;;  %v1565_v20 = vsub.f32 1.0, %v1549_v39  ;;  %v1557_v48 = vmul.f32 %v3102_v22, %v3102_v22 }
 0x423   : > { %2284 = vmatprep.mubr.bf16.mxu1 %v1378_v21 }
 0x424   : > { %2285 = vmatmul.mubr.bf16.gmra.mxu1 %v1379_v15 }
 0x428   : > { %v2583_v2 = vpop.eup %2582 }
 0x429   : > { %v2585_v26 = vpop.eup %2584  ;;  %v1354_v28 = vmul.f32 %v2583_v2, %v2583_v2 }
 0x42a   : > { %v2587_v27 = vpop.eup %2586  ;;  %v1356_v30 = vmul.f32 %v2585_v26, %v2585_v26 }
 0x42b   : > { %v1357_v13 = vmul.f32 %v2587_v27, %v2587_v27  ;;  %v1370_v42 = vsub.f32 1.0, %v1354_v28  ;;  %v1552_v27 = vmul.f32 %v3085_v57, %v3085_v57  ;;  %v1553_v28 = vmul.f32 %v3087_v58, %v3087_v58 }
 0x42c   : > { %v2589_v29 = vpop.eup %2588  ;;  %v1372_v10 = vsub.f32 1.0, %v1356_v30  ;;  %v1571_v30 = vsub.f32 1.0, %v1555_v44  ;;  %v1558_v57 = vmul.f32 %v3106_v23, %v3106_v23  ;;  %v1559_v58 = vmul.f32 %v3108_v25, %v3108_v25 }
 0x42d   : > { %v1355_v31 = vmul.f32 %v2589_v29, %v2589_v29  ;;  %v1373_v3 = vsub.f32 1.0, %v1357_v13  ;;  %v1570_v29 = vsub.f32 1.0, %v1554_v43  ;;  %v1572_v23 = vsub.f32 1.0, %v1556_v34 }
 0x42e   : > { %v1574_v35 = vsub.f32 1.0, %v1558_v57 }
 0x42f   : > { %v1371_v41 = vsub.f32 1.0, %v1355_v31  ;;  %v1381_v46 = vpack.c.bf16 %v1373_v3, %v1372_v10  ;;  %v1569_v10 = vsub.f32 1.0, %v1553_v28 }
 0x431   : > { %v1380_v45 = vpack.c.bf16 %v1371_v41, %v1370_v42  ;;  %v1568_v42 = vsub.f32 1.0, %v1552_v27 }
 0x433   : > { %2288 = vmatprep.mubr.bf16.mxu1 %v1380_v45 }
 0x434   : > { %2289 = vmatmul.mubr.bf16.gmra.mxu1 %v1381_v46 }
 0x435   : > { %1769 = vmatprep.mubr.bf16.mxu1 %v2747_v49 }
 0x4c4   : > { %v2278_v11 = vpop.f32.mrf.mxu1 }
 0x4c5   : > { %v1578_v16 = vmul.f32 %v2278_v11, %v1562_v54  ;;  %v1575_v11 = vsub.f32 1.0, %v1559_v58  ;;  %v1573_v54 = vsub.f32 1.0, %v1557_v48 }
 0x4c6   : > { %v1481_v53 = vpop.f32.mrf.mxu1 }
 0x4c7   : > { %v1576_v37 = vmul.f32 %v1560_v56, %v1481_v53 }
 0x4c8   : > { %v2279_v36 = vpop.f32.mrf.mxu1 }
 0x4c9   : > { %v1579_v9 = vmul.f32 %v2279_v36, %v1563_v55 }
 0x4ca   : > { %v1484_v7 = vpop.f32.mrf.mxu1 }
 0x4cb   : > { %v1593_v24 = vpack.c.bf16 %v1579_v9, %v1578_v16  ;;  %v1577_v51 = vmul.f32 %v1561_v59, %v1484_v7 }
 0x4cd   : > { %v1592_v38 = vpack.c.bf16 %v1577_v51, %v1576_v37 }
 0x4cf   : > { %1730 = vmatmul.mubr.bf16.vlgmr.msra.gmra.mxu0 %v1592_v38 }
 0x4d0   : > { %1739 = vmatprep.mubr.bf16.mxu0 %v2747_v49 }
 0x4d4   : > { %v2282_v4 = vpop.f32.mrf.mxu1 }
 0x4d5   : > { %v1582_v1 = vmul.f32 %v2282_v4, %v1566_v40 }
 0x4d6   : > { %v1497_v61 = vpop.f32.mrf.mxu1 }
 0x4d7   : > { %1740 = vmatmul.mubr.bf16.gmra.mxu0 %v1593_v24  ;;  %v1580_v50 = vmul.f32 %v1564_v6, %v1497_v61 }
 0x4d8   : > { %v2283_v63 = vpop.f32.mrf.mxu1  ;;  %1749 = vmatprep.mubr.bf16.mxu0 %v2747_v49 }
 0x4d9   : > { %v1583_v17 = vmul.f32 %v2283_v63, %v1567_v62 }
 0x4da   : > { %v1500_v19 = vpop.f32.mrf.mxu1 }
 0x4db   : > { %v1595_v21 = vpack.c.bf16 %v1583_v17, %v1582_v1  ;;  %v1581_v15 = vmul.f32 %v1565_v20, %v1500_v19 }
 0x4dd   : > { %v1594_v2 = vpack.c.bf16 %v1581_v15, %v1580_v50 }
 0x4df   : > { %1750 = vmatmul.mubr.bf16.gmra.mxu0 %v1594_v2 }
 0x4e0   : > { %1759 = vmatprep.mubr.bf16.mxu0 %v2747_v49 }
 0x4e4   : > { %v2286_v26 = vpop.f32.mrf.mxu1 }
 0x4e5   : > { %v1586_v3 = vmul.f32 %v2286_v26, %v1570_v29 }
 0x4e6   : > { %v1513_v13 = vpop.f32.mrf.mxu1 }
 0x4e7   : > { %1760 = vmatmul.mubr.bf16.gmra.mxu0 %v1595_v21  ;;  %v1584_v45 = vmul.f32 %v1568_v42, %v1513_v13 }
 0x4e8   : > { %v2287_v31 = vpop.f32.mrf.mxu1 }
 0x4e9   : > { %v1587_v41 = vmul.f32 %v2287_v31, %v1571_v30 }
 0x4ea   : > { %v1516_v0 = vpop.f32.mrf.mxu1 }
 0x4eb   : > { %v1597_v46 = vpack.c.bf16 %v1587_v41, %v1586_v3  ;;  %v1585_v14 = vmul.f32 %v1569_v10, %v1516_v0 }
 0x4ed   : > { %v1596_v33 = vpack.c.bf16 %v1585_v14, %v1584_v45 }
 0x4ef   : > { %1770 = vmatmul.mubr.bf16.vlgmr.msra.gmra.mxu1 %v1596_v33 }
 0x4f0   : > { %1779 = vmatprep.mubr.bf16.mxu1 %v2747_v49 }
 0x4f4   : > { %v2290_v47 = vpop.f32.mrf.mxu1 }
 0x4f5   : > { %v1590_v52 = vmul.f32 %v2290_v47, %v1574_v35 }
 0x4f6   : > { %v1529_v8 = vpop.f32.mrf.mxu1 }
 0x4f7   : > { %1780 = vmatmul.mubr.bf16.gmra.mxu1 %v1597_v46  ;;  %v1588_v55 = vmul.f32 %v1572_v23, %v1529_v8 }
 0x4f8   : > { %v2291_v18 = vpop.f32.mrf.mxu1  ;;  %1789 = vmatprep.mubr.bf16.mxu1 %v2747_v49 }
 0x4f9   : > { %v1591_v53 = vmul.f32 %v2291_v18, %v1575_v11 }
 0x4fa   : > { %v1532_v25 = vpop.f32.mrf.mxu1 }
 0x4fb   : > { %v1599_v36 = vpack.c.bf16 %v1591_v53, %v1590_v52  ;;  %v1589_v16 = vmul.f32 %v1573_v54, %v1532_v25 }
 0x4fd   : > { %v1598_v12 = vpack.c.bf16 %v1589_v16, %v1588_v55 }
 0x4ff   : > { %1790 = vmatmul.mubr.bf16.gmra.mxu1 %v1598_v12 }
 0x500   : > { %1799 = vmatprep.mubr.bf16.mxu1 %v2747_v49 }
 0x507   : > { %1800 = vmatmul.mubr.bf16.gmra.mxu1 %v1599_v36 }
 0x58f   : > { %v1731_v22 = vpop.f32.mrf.mxu0 }
 0x590   : > { %1810 = vst [vmem:[%s3218_s26] sm:$0xff] %v1731_v22 }
 0x591   : > { %v1733_v56 = vpop.f32.mrf.mxu0 }
 0x592   : > { %1811 = vst [vmem:[%s3218_s26 + $0x8] sm:$0xff] %v1733_v56 }
 0x593   : > { %v1735_v9 = vpop.f32.mrf.mxu0 }
 0x594   : > { %1812 = vst [vmem:[%s3218_s26 + $0x10] sm:$0xff] %v1735_v9 }
 0x595   : > { %v1737_v49 = vpop.f32.mrf.mxu0 }
 0x596   : > { %1813 = vst [vmem:[%s3218_s26 + $0x18] sm:$0xff] %v1737_v49 }
 0x597   : > { %v1741_v59 = vpop.f32.mrf.mxu0 }
 0x598   : > { %1814 = vst [vmem:[%s3218_s26 + $0x20] sm:$0xff] %v1741_v59 }
 0x599   : > { %v1743_v7 = vpop.f32.mrf.mxu0 }
 0x59a   : > { %1815 = vst [vmem:[%s3218_s26 + $0x28] sm:$0xff] %v1743_v7 }
 0x59b   : > { %v1745_v37 = vpop.f32.mrf.mxu0 }
 0x59c   : > { %1816 = vst [vmem:[%s3218_s26 + $0x30] sm:$0xff] %v1745_v37 }
 0x59d   : > { %v1747_v24 = vpop.f32.mrf.mxu0 }
 0x59e   : > { %1817 = vst [vmem:[%s3218_s26 + $0x38] sm:$0xff] %v1747_v24 }
 0x59f   : > { %v1751_v51 = vpop.f32.mrf.mxu0 }
 0x5a0   : > { %1818 = vst [vmem:[%s3218_s26 + $0x40] sm:$0xff] %v1751_v51 }
 0x5a1   : > { %v1753_v38 = vpop.f32.mrf.mxu0 }
 0x5a2   : > { %1819 = vst [vmem:[%s3218_s26 + $0x48] sm:$0xff] %v1753_v38 }
 0x5a3   : > { %v1755_v32 = vpop.f32.mrf.mxu0 }
 0x5a4   : > { %1820 = vst [vmem:[%s3218_s26 + $0x50] sm:$0xff] %v1755_v32 }
 0x5a5   : > { %v1757_v5 = vpop.f32.mrf.mxu0 }
 0x5a6   : > { %1821 = vst [vmem:[%s3218_s26 + $0x58] sm:$0xff] %v1757_v5 }
 0x5a7   : > { %v1761_v4 = vpop.f32.mrf.mxu0 }
 0x5a8   : > { %1822 = vst [vmem:[%s3218_s26 + $0x60] sm:$0xff] %v1761_v4 }
 0x5a9   : > { %v1763_v60 = vpop.f32.mrf.mxu0 }
 0x5aa   : > { %1823 = vst [vmem:[%s3218_s26 + $0x68] sm:$0xff] %v1763_v60 }
 0x5ab   : > { %v1765_v39 = vpop.f32.mrf.mxu0 }
 0x5ac   : > { %1824 = vst [vmem:[%s3218_s26 + $0x70] sm:$0xff] %v1765_v39 }
 0x5ad   : > { %v1767_v61 = vpop.f32.mrf.mxu0 }
 0x5ae   : > { %1825 = vst [vmem:[%s3218_s26 + $0x78] sm:$0xff] %v1767_v61 }
 0x5af   : > { %v1771_v40 = vpop.f32.mrf.mxu1 }
 0x5b0   : > { %1826 = vst [vmem:[%s3218_s26 + $0x80] sm:$0xff] %v1771_v40 }
 0x5b1   : > { %v1773_v62 = vpop.f32.mrf.mxu1 }
 0x5b2   : > { %1827 = vst [vmem:[%s3218_s26 + $0x88] sm:$0xff] %v1773_v62 }
 0x5b3   : > { %v1775_v63 = vpop.f32.mrf.mxu1 }
 0x5b4   : > { %1828 = vst [vmem:[%s3218_s26 + $0x90] sm:$0xff] %v1775_v63 }
 0x5b5   : > { %v1777_v1 = vpop.f32.mrf.mxu1 }
 0x5b6   : > { %1829 = vst [vmem:[%s3218_s26 + $0x98] sm:$0xff] %v1777_v1 }
 0x5b7   : > { %v1781_v6 = vpop.f32.mrf.mxu1 }
 0x5b8   : > { %1830 = vst [vmem:[%s3218_s26 + $0xa0] sm:$0xff] %v1781_v6 }
 0x5b9   : > { %v1783_v17 = vpop.f32.mrf.mxu1 }
 0x5ba   : > { %1831 = vst [vmem:[%s3218_s26 + $0xa8] sm:$0xff] %v1783_v17 }
 0x5bb   : > { %v1785_v20 = vpop.f32.mrf.mxu1 }
 0x5bc   : > { %1832 = vst [vmem:[%s3218_s26 + $0xb0] sm:$0xff] %v1785_v20 }
 0x5bd   : > { %v1787_v19 = vpop.f32.mrf.mxu1 }
 0x5be   : > { %1833 = vst [vmem:[%s3218_s26 + $0xb8] sm:$0xff] %v1787_v19 }
 0x5bf   : > { %v1791_v50 = vpop.f32.mrf.mxu1 }
 0x5c0   : > { %1834 = vst [vmem:[%s3218_s26 + $0xc0] sm:$0xff] %v1791_v50 }
 0x5c1   : > { %v1793_v21 = vpop.f32.mrf.mxu1 }
 0x5c2   : > { %1835 = vst [vmem:[%s3218_s26 + $0xc8] sm:$0xff] %v1793_v21 }
 0x5c3   : > { %v1795_v15 = vpop.f32.mrf.mxu1 }
 0x5c4   : > { %1836 = vst [vmem:[%s3218_s26 + $0xd0] sm:$0xff] %v1795_v15 }
 0x5c5   : > { %v1797_v2 = vpop.f32.mrf.mxu1 }
 0x5c6   : > { %1837 = vst [vmem:[%s3218_s26 + $0xd8] sm:$0xff] %v1797_v2 }
 0x5c7   : > { %v1801_v43 = vpop.f32.mrf.mxu1 }
 0x5c8   : > { %1838 = vst [vmem:[%s3218_s26 + $0xe0] sm:$0xff] %v1801_v43 }
 0x5c9   : > { %v1803_v44 = vpop.f32.mrf.mxu1 }
 0x5ca   : > { %1839 = vst [vmem:[%s3218_s26 + $0xe8] sm:$0xff] %v1803_v44 }
 0x5cb   : > { %v1805_v26 = vpop.f32.mrf.mxu1 }
 0x5cc   : > { %1840 = vst [vmem:[%s3218_s26 + $0xf0] sm:$0xff] %v1805_v26 }
 0x5cd   : > { %v1807_v27 = vpop.f32.mrf.mxu1 }
 0x5ce   : > { %1841 = vst [vmem:[%s3218_s26 + $0xf8] sm:$0xff] %v1807_v27 }
 0x5cf   : > { %2683 = shalt.err (!%p2680_p9)
}
 0x5d0   : > { %s2684_s10 = scalar_lea.hbm %s3255_s27, 4096  ;;  %s2688_s8 = scalar_lea.hbm %s3306_s4, 8192 }
 0x5d1   : > { %p2685_p13 = scmp.ne.s32.totalorder %s3255_s27, %s2684_s10  ;;  %p2689_p4 = scmp.lt.s32.totalorder %s3255_s27, %s3306_s4 }
 0x5d2   : > { %p2690_p8 = scmp.lt.s32.totalorder %s2688_s8, %s2684_s10 }
 0x5d3   : > { %p2686_p5 = pnand %p2685_p13, %p3322_p10 }
 0x5d4   : > { %p2691_p7 = por %p2690_p8, %p2689_p4 }
 0x5d5   : > { %p2687_p0 = pneg %p2686_p5 }
 0x5d7   : > { %p2692_p11 = pnand %p2691_p7, %p2687_p0 }
 0x5d9   : > { %2695 = shalt.err (!%p2692_p11)
}
 0x5da   : > { %s2749_s26 = smov 256   ;;  %s2750_s30 = smov 16  }
 0x5db   : > { %2318 = dma.vmem_to_hbm [thread:$0]  (%p3322_p10), %s3257_s6, 4096, %s3255_s27, %s1843_s28, %s2749_s26, %s2749_s26, %s2750_s30  }
 0x5dc PF: > { %s1872_s14 = sand.u32 1, %s2726_s15   ;;  %p3323_p1 = scmp.ne.s32.totalorder %s3312_s22, 0 }
 0x5dd   : > { %p3324_p2 = scmp.ge.s32.totalorder %s2738_s18, 2  ;;  %s1873_s20 = scalar_lea.sflag [#allocation5], %s1872_s14 }
 0x5df   : > { %p2332_p6 = pnand %p3324_p2, %p3323_p1 }
 0x5e1   : > { %p2333_p12 = pneg %p2332_p6 }
 0x5e3   : > { %2721 = dma.done.wait (%p2333_p12), %s1873_s20, 4096  }
 0x5e4   : > { %2723 = vsyncadd (%p2333_p12), %s1873_s20, 4294963200  ;;  %p18_p3 = scmp.ge.s32.totalorder %s2851_s13, 4   ;;  %s3325_s15 = smov %s2730_s16 }
 0x5e5   : > { %s3326_s16 = smov %s2734_s17  ;;  %s3327_s17 = smov %s2860_s24 }
 0x5e6   : > { %s3328_s18 = smov %s2851_s13  ;;  %20 = sbr.rel (!%p18_p3) target bundleno = 6 (0x6), region = 96 }
 0x5eb   :  { %1878 = vsyncpa [#allocation4], 1 }
 0x5ec   :  { %1880 = vsyncpa [#allocation4 + $0x1], 1 }
 0x5ed   :  { %1881 = vsyncpa [#allocation7], 1 }
 0x5ee   :  { %1882 = vsyncpa [#allocation5], 1 }
 0x5ef   :  { %1884 = vsyncpa [#allocation5 + $0x1], 1 }

</bundles_post_ra>
